<compile_context>
chip_gen: v6e
topology: v6e:2x2x1
jax: 0.10.0
libtpu: 0.0.40
codegen_flags: <defaults>
</compile_context>

<pallas_src>
import functools

import numpy as np
import jax
import jax.numpy as jnp
from jax.experimental import pallas as pl
from jax.experimental.pallas import tpu as pltpu


# ---------------------------------------------------------------------------
# Fused AffineLayer kernel (one grid-less pallas_call per flow layer)
# ---------------------------------------------------------------------------
_N_INPUTS = 31      # x_flow, cond_flow, mask, mask0 + 27 parameter slabs


@functools.lru_cache(maxsize=None)
def _affine_layer_call(B, L, Wp):
    Lp = L + 2
    inv_n = 1.0 / float(B * L)

    def kernel(x_ref, c_ref, mk_ref, mk0_ref,
               f1w1, f1b1, f1w2, f1b2, f1sk, f1a1, f1a2,
               f2w1, f2b1, f2w2, f2b2, f2sk, f2a1, f2a2,
               m1w1, m1w2, m1sk, m1a1, m1a2,
               m2w1f, m2w1c, m2w2, m2skf, m2skc, m2a1, m2a2,
               wfin, out_ref):
        mask = mk_ref[...]          # (1, Wp): 1 on real columns of all B blocks
        mask0 = mk0_ref[...]        # (1, Wp): 1 on real columns of block 0 only

        def shift_r(y, s):          # columns shifted toward higher index, zero fill
            return jnp.concatenate(
                [jnp.zeros((y.shape[0], s), y.dtype), y[:, :Wp - s]], axis=1)

        def shift_l1(y):            # columns shifted by -1, zero fill
            return jnp.concatenate(
                [y[:, 1:], jnp.zeros((y.shape[0], 1), y.dtype)], axis=1)

        def stack3(y):              # taps (0,1,2): [y[:, j-1]; y[:, j]; y[:, j+1]]
            return jnp.concatenate([shift_r(y, 1), y, shift_l1(y)], axis=0)

        def stack2(y):              # masked 'B' taps (0,1)
            return jnp.concatenate([shift_r(y, 1), y], axis=0)

        def mm(w_ref, s):
            return jnp.dot(w_ref[...], s, preferred_element_type=jnp.float32)

        def prelu(v, a_ref):
            return jnp.where(v >= 0, v, a_ref[...] * v)

        def bn(v):                  # BatchNorm1d training stats over B*L real cols
            vm = v * mask
            s = jnp.sum(jnp.concatenate([vm, vm * v], axis=0),
                        axis=1, keepdims=True) * inv_n
            c = v.shape[0]
            mean, ex2 = s[:c], s[c:]
            var = jnp.maximum(ex2 - mean * mean, 0.0)
            return (v - mean) * jax.lax.rsqrt(var + 1e-5)

        def rb_unmasked(x, w1, b1, w2, b2, wsk, a1, a2, m):
            xs = stack3(x)
            h = prelu(mm(w1, xs) + b1[...], a1) * m
            return prelu(mm(w2, stack3(h)) + b2[...] + mm(wsk, xs), a2) * m

        # --- feature_net, de-duplicated to one batch block (cond is identical
        #     for every batch element) ---
        cnd = c_ref[...]
        h = rb_unmasked(cnd, f1w1, f1b1, f1w2, f1b2, f1sk, f1a1, f1a2, mask0)
        cf = rb_unmasked(h, f2w1, f2b1, f2w2, f2b2, f2sk, f2a1, f2a2, mask0)
        cf_all = cf
        for b in range(1, B):       # tile cf across the other batch blocks
            cf_all = cf_all + shift_r(cf, b * Lp)

        # --- first masked block ('A': tap 0 only, C_in=1 -> VPU broadcast) ---
        xf = x_ref[...]
        xs1 = shift_r(xf, 1)
        h1 = prelu(bn(m1w1[...] * xs1), m1a1) * mask
        fb = prelu(bn(mm(m1w2, stack2(h1)) + m1sk[...] * xs1), m1a2) * mask

        # --- second masked block ('B'): fb / cf kept separate, split matmuls ---
        fbs = stack2(fb)
        cfs = stack2(cf_all)
        h2 = prelu(bn(mm(m2w1f, fbs) + mm(m2w1c, cfs)), m2a1) * mask
        skip = mm(m2skf, fbs) + mm(m2skc, cfs)
        g = prelu(bn(mm(m2w2, stack2(h2)) + skip), m2a2) * mask

        # --- final MaskedConv1d('B', h, 2) + LowerBound + affine coupling ---
        o = mm(wfin, stack2(g))                 # (2, Wp): [mu ; sigma]
        mu = o[0:1, :]
        sg = jnp.maximum(o[1:2, :], 1e-8)       # LowerBound (forward only)
        out_ref[0:1, :] = mu + sg * xf
        out_ref[1:2, :] = -jnp.log(sg)

    vmem = pl.BlockSpec(memory_space=pltpu.MemorySpace.VMEM)
    return pl.pallas_call(
        kernel,
        out_shape=jax.ShapeDtypeStruct((2, Wp), jnp.float32),
        in_specs=[vmem] * _N_INPUTS,
        out_specs=vmem)


def _flatten_affine_params(p):
    f1, f2, fb, sb = p['fn1'], p['fn2'], p['first'], p['second']
    return [f1['w1'], f1['b1'], f1['w2'], f1['b2'], f1['wsk'], f1['a1'], f1['a2'],
            f2['w1'], f2['b1'], f2['w2'], f2['b2'], f2['wsk'], f2['a1'], f2['a2'],
            fb['w1'], fb['w2'], fb['wsk'], fb['a1'], fb['a2'],
            sb['w1_fb'], sb['w1_cf'], sb['w2'], sb['wsk_fb'], sb['wsk_cf'],
            sb['a1'], sb['a2'],
            p['wfinal']]


# ---------------------------------------------------------------------------
# Flow glue (tiny elementwise / reshape ops stay in XLA inside the jit)
# ---------------------------------------------------------------------------
def permute(x, perm, state_dim):
    B, S, L = x.shape
    xr = x.reshape(B, S, L // state_dim, state_dim)
    return xr[:, :, :, perm].reshape(B, S, L)


def flow_batchnorm(p, x, eps=1e-5):
    inputs = x[:, 0, :]                               # squeeze(1)
    mean = jnp.mean(inputs, axis=0)
    var = jnp.mean((inputs - mean) ** 2, axis=0) + eps
    x_hat = (inputs - mean) / jnp.sqrt(var)
    y = jnp.exp(p['log_gamma']) * x_hat + p['beta']
    ildj = -p['log_gamma'] + 0.5 * jnp.log(var)
    return y[:, None, :], ildj[None, None, :]


def build_cond(state_dim, t, dt, obs_mu, obs_idx):
    """Conditioning features (obs_tile ; times): (obs_dim + 1, L), host-side."""
    obs_mu = np.asarray(obs_mu, np.float32)
    obs_idx = np.asarray(obs_idx)
    steps_bw_obs = int(obs_idx[1] - obs_idx[0])
    reps = np.full(len(obs_idx), state_dim, dtype=np.int64)
    reps[1:] *= steps_bw_obs
    obs_tile = np.repeat(obs_mu, reps, axis=-1)                   # (obs_dim, L)
    tgrid = np.arange(0.0, t + dt, dt, dtype=np.float32)          # (n,)
    times = np.repeat(tgrid, state_dim)[None, :]                  # (1, L)
    return np.concatenate([obs_tile, times], axis=0).astype(np.float32)


def make_sde_flow(B, state_dim, n, cond, num_layers):
    L = state_dim * n
    Lp = L + 2
    W = B * Lp
    Wp = max(128, ((W + 127) // 128) * 128)       # lane-dense flow width
    cond_ch = cond.shape[0]

    # host-built constants: single-block cond in flow layout + interior masks
    cond0 = np.zeros((cond_ch, Wp), np.float32)
    cond0[:, 1:L + 1] = cond
    col = np.arange(Wp)
    real = ((col % Lp) >= 1) & ((col % Lp) <= L)
    mask_full = (real & (col < W)).astype(np.float32)[None, :]
    mask0 = (real & (col < Lp)).astype(np.float32)[None, :]
    cond0 = jnp.asarray(cond0)
    mask_full = jnp.asarray(mask_full)
    mask0 = jnp.asarray(mask0)

    call = _affine_layer_call(B, L, Wp)

    def to_flow(x):                      # (B, C, L) -> (C, Wp)
        C = x.shape[1]
        xp = jnp.pad(x, ((0, 0), (0, 0), (1, 1)))
        xf = jnp.transpose(xp, (1, 0, 2)).reshape(C, W)
        return jnp.pad(xf, ((0, 0), (0, Wp - W)))

    def from_flow(yf, C=1):              # (C, Wp) -> (B, C, L)
        y = yf[:, :W].reshape(C, B, Lp)[:, :, 1:L + 1]
        return jnp.transpose(y, (1, 0, 2))

    def affine(p, xf):
        args = [xf, cond0, mask_full, mask0] + _flatten_affine_params(p)
        assert len(args) == _N_INPUTS
        o = call(*args)                  # (2, Wp): [x_new ; -log sigma]
        return o[0:1], o[1:2]

    def forward(params, eps):
        log_prob = jnp.sum(-0.5 * eps ** 2 - 0.5 * np.log(2.0 * np.pi), axis=-1)
        x = eps
        ildjs = []
        for i in range(num_layers):
            x = permute(x, params['perms'][i], state_dim)
            xo_f, nls_f = affine(params['affine'][i], to_flow(x))
            x = from_flow(xo_f)
            if i < num_layers - 1:
                x, bn_ildj = flow_batchnorm(params['bn'][i], x)
                ildjs.append(bn_ildj)
            ildjs.append(from_flow(nls_f))
        y = jax.nn.softplus(x)                          # SoftplusLayer
        ildjs.append(-jnp.log(-jnp.expm1(-y)))
        out = y.reshape(B, -1, state_dim) + 1e-6
        for ildj in ildjs:
            log_prob = log_prob + jnp.sum(ildj, axis=-1)
        return out, log_prob

    return jax.jit(forward)


# ---------------------------------------------------------------------------
# Parameter init -- weights stored kernel-ready as stacked (C_out, T*C_in)
# ---------------------------------------------------------------------------
def _uniform(key, shape, bound):
    return jax.random.uniform(key, shape, jnp.float32, -bound, bound)


def init_conv_stacked(key, c_out, c_in, taps=(0, 1, 2), bias=True):
    """Conv1d(c_in, c_out, 3); only the statically non-zero masked taps kept."""
    kw, kb = jax.random.split(key)
    bound = 1.0 / np.sqrt(c_in * 3)
    w = _uniform(kw, (c_out, c_in, 3), bound)                # torch layout
    w_stack = jnp.concatenate([w[:, :, k] for k in taps], axis=1)
    b = _uniform(kb, (c_out, 1), bound) if bias else None
    return w_stack, b


def init_rb_unmasked(key, c_in, c_out):
    k1, k2, k3 = jax.random.split(key, 3)
    w1, b1 = init_conv_stacked(k1, c_out, c_in)
    w2, b2 = init_conv_stacked(k2, c_out, c_out)
    wsk = init_conv_stacked(k3, c_out, c_in, bias=False)[0]
    a = 0.2 * jnp.ones((c_out, 1), jnp.float32)
    return dict(w1=w1, b1=b1, w2=w2, b2=b2, wsk=wsk, a1=a, a2=a)


def init_rb_first(key, c_out):
    k1, k2, k3 = jax.random.split(key, 3)
    w1 = init_conv_stacked(k1, c_out, 1, taps=(0,), bias=False)[0]        # 'A'
    w2 = init_conv_stacked(k2, c_out, c_out, taps=(0, 1), bias=False)[0]  # 'B'
    wsk = init_conv_stacked(k3, c_out, 1, taps=(0,), bias=False)[0]       # 'A'
    a = 0.2 * jnp.ones((c_out, 1), jnp.float32)
    return dict(w1=w1, w2=w2, wsk=wsk, a1=a, a2=a)


def init_rb_second(key, c_fb, c_cf, c_out):
    k1, k2, k3 = jax.random.split(key, 3)
    c_in = c_fb + c_cf
    bound = 1.0 / np.sqrt(c_in * 3)
    w1 = _uniform(k1, (c_out, c_in, 3), bound)
    wsk = _uniform(k3, (c_out, c_in, 3), bound)
    w2 = init_conv_stacked(k2, c_out, c_out, taps=(0, 1), bias=False)[0]

    def split_stack(w):   # 'B' taps (0, 1), C_in split at c_fb (fb first, then cf)
        w_fb = jnp.concatenate([w[:, :c_fb, k] for k in (0, 1)], axis=1)
        w_cf = jnp.concatenate([w[:, c_fb:, k] for k in (0, 1)], axis=1)
        return w_fb, w_cf

    w1_fb, w1_cf = split_stack(w1)
    wsk_fb, wsk_cf = split_stack(wsk)
    a = 0.2 * jnp.ones((c_out, 1), jnp.float32)
    return dict(w1_fb=w1_fb, w1_cf=w1_cf, w2=w2, wsk_fb=wsk_fb, wsk_cf=wsk_cf,
                a1=a, a2=a)


def init_affine(key, cond_ch, h_cha):
    assert h_cha != cond_ch and h_cha != 1    # skip convs always present here
    k1, k2, k3, k4, k5 = jax.random.split(key, 5)
    return dict(
        fn1=init_rb_unmasked(k1, cond_ch, h_cha),
        fn2=init_rb_unmasked(k2, h_cha, cond_ch),
        first=init_rb_first(k3, h_cha),
        second=init_rb_second(k4, h_cha, cond_ch, h_cha),
        wfinal=init_conv_stacked(k5, 2, h_cha, taps=(0, 1), bias=False)[0],
    )


# ---------------------------------------------------------------------------
# Pure-JAX reference (no Pallas) used as a runtime correctness check
# ---------------------------------------------------------------------------
def _unstack(w_stack, c_in):
    T = w_stack.shape[1] // c_in
    return [w_stack[:, t * c_in:(t + 1) * c_in] for t in range(T)]


def _ref_conv(x, w_stack, taps, bias=None):
    _, C, L = x.shape
    xp = jnp.pad(x, ((0, 0), (0, 0), (1, 1)))
    ws = _unstack(w_stack, C)
    y = 0.0
    for i, k in enumerate(taps):
        y = y + jnp.einsum('oc,bcl->bol', ws[i], xp[:, :, k:k + L],
                           precision=jax.lax.Precision.HIGHEST)
    if bias is not None:
        y = y + bias[None]
    return y


def _ref_prelu(x, a):
    return jnp.where(x >= 0, x, a[None] * x)


def _ref_bn(x, eps=1e-5):
    mean = jnp.mean(x, axis=(0, 2), keepdims=True)
    ex2 = jnp.mean(x * x, axis=(0, 2), keepdims=True)
    var = jnp.maximum(ex2 - mean * mean, 0.0)
    return (x - mean) * jax.lax.rsqrt(var + eps)


def _ref_rb_unmasked(p, x):
    h = _ref_prelu(_ref_conv(x, p['w1'], (0, 1, 2), p['b1']), p['a1'])
    skip = _ref_conv(x, p['wsk'], (0, 1, 2))
    return _ref_prelu(_ref_conv(h, p['w2'], (0, 1, 2), p['b2']) + skip, p['a2'])


def _ref_rb_first(p, x):
    h = _ref_prelu(_ref_bn(_ref_conv(x, p['w1'], (0,))), p['a1'])
    skip = _ref_conv(x, p['wsk'], (0,))
    return _ref_prelu(_ref_bn(_ref_conv(h, p['w2'], (0, 1)) + skip), p['a2'])


def _ref_rb_second(p, fb, cf):
    c1 = _ref_conv(fb, p['w1_fb'], (0, 1)) + _ref_conv(cf, p['w1_cf'], (0, 1))
    h = _ref_prelu(_ref_bn(c1), p['a1'])
    skip = _ref_conv(fb, p['wsk_fb'], (0, 1)) + _ref_conv(cf, p['wsk_cf'], (0, 1))
    return _ref_prelu(_ref_bn(_ref_conv(h, p['w2'], (0, 1)) + skip), p['a2'])


def _ref_affine(p, x, cond):
    cf = _ref_rb_unmasked(p['fn2'], _ref_rb_unmasked(p['fn1'], cond))
    fb = _ref_rb_first(p['first'], x)
    h2 = _ref_rb_second(p['second'], fb, cf)
    o = _ref_conv(h2, p['wfinal'], (0, 1))
    mu, sg = o[:, 0:1], jnp.maximum(o[:, 1:2], 1e-8)
    return mu + sg * x, -jnp.log(sg)


def ref_forward(params, eps, cond_b, state_dim, num_layers):
    B = eps.shape[0]
    log_prob = jnp.sum(-0.5 * eps ** 2 - 0.5 * np.log(2.0 * np.pi), axis=-1)
    x = eps
    ildjs = []
    for i in range(num_layers):
        x = permute(x, params['perms'][i], state_dim)
        x, cl = _ref_affine(params['affine'][i], x, cond_b)
        if i < num_layers - 1:
            x, bn = flow_batchnorm(params['bn'][i], x)
            ildjs.append(bn)
        ildjs.append(cl)
    y = jax.nn.softplus(x)
    ildjs.append(-jnp.log(-jnp.expm1(-y)))
    out = y.reshape(B, -1, state_dim) + 1e-6
    for ildj in ildjs:
        log_prob = log_prob + jnp.sum(ildj, axis=-1)
    return out, log_prob


# ---------------------------------------------------------------------------
if __name__ == "__main__":
    # small, self-consistent configuration
    B = 2               # BATCH_SIZE
    STATE_DIM = 3
    DT = 1.0
    T = 8.0
    N = 9               # number of time points = T/DT + 1
    OBS_DIM = 1
    OBS_EVERY = 4
    H_CHA = 32          # hidden channels (AffineLayer h_cha, shrunk for the test)
    NUM_LAYERS = 2
    COND_INPUTS = 1
    L = STATE_DIM * N
    COND_CH = COND_INPUTS + OBS_DIM     # channels entering each AffineLayer

    obs_idx = np.arange(0, N, OBS_EVERY)              # [0, 4, 8]
    key = jax.random.PRNGKey(0)
    k_params, k_eps, k_mu, k_perm, k_bn = jax.random.split(key, 5)

    obs_mu = np.asarray(jax.random.normal(k_mu, (OBS_DIM, len(obs_idx)), jnp.float32))

    affine_keys = jax.random.split(k_params, NUM_LAYERS)
    perm_keys = jax.random.split(k_perm, NUM_LAYERS)
    bn_keys = jax.random.split(k_bn, max(NUM_LAYERS - 1, 1))

    params = {
        'affine': [init_affine(affine_keys[i], COND_CH, H_CHA)
                   for i in range(NUM_LAYERS)],
        'perms': [np.asarray(jax.random.permutation(perm_keys[i], STATE_DIM))
                  for i in range(NUM_LAYERS)],
        'bn': [],
    }
    for i in range(NUM_LAYERS - 1):
        kg, kb = jax.random.split(bn_keys[i])
        params['bn'].append(dict(
            log_gamma=jax.random.uniform(kg, (L,), jnp.float32),
            beta=jax.random.uniform(kb, (L,), jnp.float32)))

    cond = build_cond(STATE_DIM, T, DT, obs_mu, obs_idx)          # (COND_CH, L)
    forward = make_sde_flow(B, STATE_DIM, N, cond, NUM_LAYERS)

    eps = jax.random.normal(k_eps, (B, 1, L), jnp.float32)
    out, log_prob = jax.block_until_ready(forward(params, eps))

    assert out.shape == (B, N, STATE_DIM), out.shape
    assert log_prob.shape == (B, 1), log_prob.shape
    assert bool(jnp.all(jnp.isfinite(out))) and bool(jnp.all(jnp.isfinite(log_prob)))

    # runtime check of the fused Pallas path against a pure-JAX reference
    cond_b = jnp.broadcast_to(jnp.asarray(cond)[None], (B, COND_CH, L))
    out_r, lp_r = jax.block_until_ready(
        jax.jit(lambda p, e: ref_forward(p, e, cond_b, STATE_DIM, NUM_LAYERS))(params, eps))
    np.testing.assert_allclose(np.asarray(out), np.asarray(out_r), rtol=1e-2, atol=1e-2)
    np.testing.assert_allclose(np.asarray(log_prob), np.asarray(lp_r), rtol=1e-2, atol=0.5)

    print("KERNEL_OK")
</pallas_src>

<mosaic_0001>
module attributes {stable_mosaic.version = 11 : i64} {
  func.func @kernel(%arg0: memref<1x128xf32, #tpu.memory_space<vmem>>, %arg1: memref<2x128xf32, #tpu.memory_space<vmem>>, %arg2: memref<1x128xf32, #tpu.memory_space<vmem>>, %arg3: memref<1x128xf32, #tpu.memory_space<vmem>>, %arg4: memref<32x6xf32, #tpu.memory_space<vmem>>, %arg5: memref<32x1xf32, #tpu.memory_space<vmem>>, %arg6: memref<32x96xf32, #tpu.memory_space<vmem>>, %arg7: memref<32x1xf32, #tpu.memory_space<vmem>>, %arg8: memref<32x6xf32, #tpu.memory_space<vmem>>, %arg9: memref<32x1xf32, #tpu.memory_space<vmem>>, %arg10: memref<32x1xf32, #tpu.memory_space<vmem>>, %arg11: memref<2x96xf32, #tpu.memory_space<vmem>>, %arg12: memref<2x1xf32, #tpu.memory_space<vmem>>, %arg13: memref<2x6xf32, #tpu.memory_space<vmem>>, %arg14: memref<2x1xf32, #tpu.memory_space<vmem>>, %arg15: memref<2x96xf32, #tpu.memory_space<vmem>>, %arg16: memref<2x1xf32, #tpu.memory_space<vmem>>, %arg17: memref<2x1xf32, #tpu.memory_space<vmem>>, %arg18: memref<32x1xf32, #tpu.memory_space<vmem>>, %arg19: memref<32x64xf32, #tpu.memory_space<vmem>>, %arg20: memref<32x1xf32, #tpu.memory_space<vmem>>, %arg21: memref<32x1xf32, #tpu.memory_space<vmem>>, %arg22: memref<32x1xf32, #tpu.memory_space<vmem>>, %arg23: memref<32x64xf32, #tpu.memory_space<vmem>>, %arg24: memref<32x4xf32, #tpu.memory_space<vmem>>, %arg25: memref<32x64xf32, #tpu.memory_space<vmem>>, %arg26: memref<32x64xf32, #tpu.memory_space<vmem>>, %arg27: memref<32x4xf32, #tpu.memory_space<vmem>>, %arg28: memref<32x1xf32, #tpu.memory_space<vmem>>, %arg29: memref<32x1xf32, #tpu.memory_space<vmem>>, %arg30: memref<2x64xf32, #tpu.memory_space<vmem>>, %arg31: memref<2x128xf32, #tpu.memory_space<vmem>>) attributes {dimension_semantics = [], scalar_prefetch = 0 : i64, scratch_operands = 0 : i64, tpu.core_type = #tpu.core_type<tc>} {
    %c0 = arith.constant 0 : index
    %c0_0 = arith.constant 0 : index
    %0 = vector.load %arg2[%c0, %c0_0] : memref<1x128xf32, #tpu.memory_space<vmem>>, vector<1x128xf32>
    %c0_1 = arith.constant 0 : index
    %c0_2 = arith.constant 0 : index
    %1 = vector.load %arg3[%c0_1, %c0_2] : memref<1x128xf32, #tpu.memory_space<vmem>>, vector<1x128xf32>
    %c0_3 = arith.constant 0 : index
    %c0_4 = arith.constant 0 : index
    %2 = vector.load %arg1[%c0_3, %c0_4] : memref<2x128xf32, #tpu.memory_space<vmem>>, vector<2x128xf32>
    %cst = arith.constant 0.000000e+00 : f32
    %3 = vector.broadcast %cst : f32 to vector<2x1xf32>
    %4 = vector.extract_strided_slice %2 {offsets = [0, 0], sizes = [2, 127], strides = [1, 1]} : vector<2x128xf32> to vector<2x127xf32>
    %5 = tpu.concatenate %3, %4 in 1 : vector<2x1xf32>, vector<2x127xf32> -> vector<2x128xf32>
    %6 = vector.extract_strided_slice %2 {offsets = [0, 1], sizes = [2, 127], strides = [1, 1]} : vector<2x128xf32> to vector<2x127xf32>
    %cst_5 = arith.constant 0.000000e+00 : f32
    %7 = vector.broadcast %cst_5 : f32 to vector<2x1xf32>
    %8 = tpu.concatenate %6, %7 in 1 : vector<2x127xf32>, vector<2x1xf32> -> vector<2x128xf32>
    %9 = tpu.concatenate %5, %2, %8 in 0 : vector<2x128xf32>, vector<2x128xf32>, vector<2x128xf32> -> vector<6x128xf32>
    %c0_6 = arith.constant 0 : index
    %c0_7 = arith.constant 0 : index
    %10 = vector.load %arg4[%c0_6, %c0_7] : memref<32x6xf32, #tpu.memory_space<vmem>>, vector<32x6xf32>
    %cst_8 = arith.constant dense<0.000000e+00> : vector<32x128xf32>
    %11 = tpu.matmul %10, %9, %cst_8 {dimension_numbers = #tpu.dot_dimension_numbers<[1], [0], [0], [1], [0, 0, 1, 1], [], []>} : vector<32x6xf32>, vector<6x128xf32>, vector<32x128xf32> -> vector<32x128xf32>
    %c0_9 = arith.constant 0 : index
    %c0_10 = arith.constant 0 : index
    %12 = vector.load %arg5[%c0_9, %c0_10] : memref<32x1xf32, #tpu.memory_space<vmem>>, vector<32x1xf32>
    %13 = vector.broadcast %12 : vector<32x1xf32> to vector<32x128xf32>
    %14 = arith.addf %11, %13 : vector<32x128xf32>
    %cst_11 = arith.constant 0.000000e+00 : f32
    %15 = vector.broadcast %cst_11 : f32 to vector<32x128xf32>
    %16 = arith.cmpf oge, %14, %15 : vector<32x128xf32>
    %c0_12 = arith.constant 0 : index
    %c0_13 = arith.constant 0 : index
    %17 = vector.load %arg9[%c0_12, %c0_13] : memref<32x1xf32, #tpu.memory_space<vmem>>, vector<32x1xf32>
    %18 = vector.broadcast %17 : vector<32x1xf32> to vector<32x128xf32>
    %19 = arith.mulf %18, %14 : vector<32x128xf32>
    %20 = arith.select %16, %14, %19 : vector<32x128xi1>, vector<32x128xf32>
    %21 = vector.broadcast %1 : vector<1x128xf32> to vector<32x128xf32>
    %22 = arith.mulf %20, %21 : vector<32x128xf32>
    %cst_14 = arith.constant 0.000000e+00 : f32
    %23 = vector.broadcast %cst_14 : f32 to vector<32x1xf32>
    %24 = vector.extract_strided_slice %22 {offsets = [0, 0], sizes = [32, 127], strides = [1, 1]} : vector<32x128xf32> to vector<32x127xf32>
    %25 = tpu.concatenate %23, %24 in 1 : vector<32x1xf32>, vector<32x127xf32> -> vector<32x128xf32>
    %26 = vector.extract_strided_slice %22 {offsets = [0, 1], sizes = [32, 127], strides = [1, 1]} : vector<32x128xf32> to vector<32x127xf32>
    %cst_15 = arith.constant 0.000000e+00 : f32
    %27 = vector.broadcast %cst_15 : f32 to vector<32x1xf32>
    %28 = tpu.concatenate %26, %27 in 1 : vector<32x127xf32>, vector<32x1xf32> -> vector<32x128xf32>
    %29 = tpu.concatenate %25, %22, %28 in 0 : vector<32x128xf32>, vector<32x128xf32>, vector<32x128xf32> -> vector<96x128xf32>
    %c0_16 = arith.constant 0 : index
    %c0_17 = arith.constant 0 : index
    %30 = vector.load %arg6[%c0_16, %c0_17] : memref<32x96xf32, #tpu.memory_space<vmem>>, vector<32x96xf32>
    %cst_18 = arith.constant dense<0.000000e+00> : vector<32x128xf32>
    %31 = tpu.matmul %30, %29, %cst_18 {dimension_numbers = #tpu.dot_dimension_numbers<[1], [0], [0], [1], [0, 0, 1, 1], [], []>} : vector<32x96xf32>, vector<96x128xf32>, vector<32x128xf32> -> vector<32x128xf32>
    %c0_19 = arith.constant 0 : index
    %c0_20 = arith.constant 0 : index
    %32 = vector.load %arg7[%c0_19, %c0_20] : memref<32x1xf32, #tpu.memory_space<vmem>>, vector<32x1xf32>
    %33 = vector.broadcast %32 : vector<32x1xf32> to vector<32x128xf32>
    %34 = arith.addf %31, %33 : vector<32x128xf32>
    %c0_21 = arith.constant 0 : index
    %c0_22 = arith.constant 0 : index
    %35 = vector.load %arg8[%c0_21, %c0_22] : memref<32x6xf32, #tpu.memory_space<vmem>>, vector<32x6xf32>
    %cst_23 = arith.constant dense<0.000000e+00> : vector<32x128xf32>
    %36 = tpu.matmul %35, %9, %cst_23 {dimension_numbers = #tpu.dot_dimension_numbers<[1], [0], [0], [1], [0, 0, 1, 1], [], []>} : vector<32x6xf32>, vector<6x128xf32>, vector<32x128xf32> -> vector<32x128xf32>
    %37 = arith.addf %34, %36 : vector<32x128xf32>
    %cst_24 = arith.constant 0.000000e+00 : f32
    %38 = vector.broadcast %cst_24 : f32 to vector<32x128xf32>
    %39 = arith.cmpf oge, %37, %38 : vector<32x128xf32>
    %c0_25 = arith.constant 0 : index
    %c0_26 = arith.constant 0 : index
    %40 = vector.load %arg10[%c0_25, %c0_26] : memref<32x1xf32, #tpu.memory_space<vmem>>, vector<32x1xf32>
    %41 = vector.broadcast %40 : vector<32x1xf32> to vector<32x128xf32>
    %42 = arith.mulf %41, %37 : vector<32x128xf32>
    %43 = arith.select %39, %37, %42 : vector<32x128xi1>, vector<32x128xf32>
    %44 = vector.broadcast %1 : vector<1x128xf32> to vector<32x128xf32>
    %45 = arith.mulf %43, %44 : vector<32x128xf32>
    %cst_27 = arith.constant 0.000000e+00 : f32
    %46 = vector.broadcast %cst_27 : f32 to vector<32x1xf32>
    %47 = vector.extract_strided_slice %45 {offsets = [0, 0], sizes = [32, 127], strides = [1, 1]} : vector<32x128xf32> to vector<32x127xf32>
    %48 = tpu.concatenate %46, %47 in 1 : vector<32x1xf32>, vector<32x127xf32> -> vector<32x128xf32>
    %49 = vector.extract_strided_slice %45 {offsets = [0, 1], sizes = [32, 127], strides = [1, 1]} : vector<32x128xf32> to vector<32x127xf32>
    %cst_28 = arith.constant 0.000000e+00 : f32
    %50 = vector.broadcast %cst_28 : f32 to vector<32x1xf32>
    %51 = tpu.concatenate %49, %50 in 1 : vector<32x127xf32>, vector<32x1xf32> -> vector<32x128xf32>
    %52 = tpu.concatenate %48, %45, %51 in 0 : vector<32x128xf32>, vector<32x128xf32>, vector<32x128xf32> -> vector<96x128xf32>
    %c0_29 = arith.constant 0 : index
    %c0_30 = arith.constant 0 : index
    %53 = vector.load %arg11[%c0_29, %c0_30] : memref<2x96xf32, #tpu.memory_space<vmem>>, vector<2x96xf32>
    %cst_31 = arith.constant dense<0.000000e+00> : vector<2x128xf32>
    %54 = tpu.matmul %53, %52, %cst_31 {dimension_numbers = #tpu.dot_dimension_numbers<[1], [0], [0], [1], [0, 0, 1, 1], [], []>} : vector<2x96xf32>, vector<96x128xf32>, vector<2x128xf32> -> vector<2x128xf32>
    %c0_32 = arith.constant 0 : index
    %c0_33 = arith.constant 0 : index
    %55 = vector.load %arg12[%c0_32, %c0_33] : memref<2x1xf32, #tpu.memory_space<vmem>>, vector<2x1xf32>
    %56 = vector.broadcast %55 : vector<2x1xf32> to vector<2x128xf32>
    %57 = arith.addf %54, %56 : vector<2x128xf32>
    %cst_34 = arith.constant 0.000000e+00 : f32
    %58 = vector.broadcast %cst_34 : f32 to vector<2x128xf32>
    %59 = arith.cmpf oge, %57, %58 : vector<2x128xf32>
    %c0_35 = arith.constant 0 : index
    %c0_36 = arith.constant 0 : index
    %60 = vector.load %arg16[%c0_35, %c0_36] : memref<2x1xf32, #tpu.memory_space<vmem>>, vector<2x1xf32>
    %61 = vector.broadcast %60 : vector<2x1xf32> to vector<2x128xf32>
    %62 = arith.mulf %61, %57 : vector<2x128xf32>
    %63 = arith.select %59, %57, %62 : vector<2x128xi1>, vector<2x128xf32>
    %64 = vector.broadcast %1 : vector<1x128xf32> to vector<2x128xf32>
    %65 = arith.mulf %63, %64 : vector<2x128xf32>
    %cst_37 = arith.constant 0.000000e+00 : f32
    %66 = vector.broadcast %cst_37 : f32 to vector<2x1xf32>
    %67 = vector.extract_strided_slice %65 {offsets = [0, 0], sizes = [2, 127], strides = [1, 1]} : vector<2x128xf32> to vector<2x127xf32>
    %68 = tpu.concatenate %66, %67 in 1 : vector<2x1xf32>, vector<2x127xf32> -> vector<2x128xf32>
    %69 = vector.extract_strided_slice %65 {offsets = [0, 1], sizes = [2, 127], strides = [1, 1]} : vector<2x128xf32> to vector<2x127xf32>
    %cst_38 = arith.constant 0.000000e+00 : f32
    %70 = vector.broadcast %cst_38 : f32 to vector<2x1xf32>
    %71 = tpu.concatenate %69, %70 in 1 : vector<2x127xf32>, vector<2x1xf32> -> vector<2x128xf32>
    %72 = tpu.concatenate %68, %65, %71 in 0 : vector<2x128xf32>, vector<2x128xf32>, vector<2x128xf32> -> vector<6x128xf32>
    %c0_39 = arith.constant 0 : index
    %c0_40 = arith.constant 0 : index
    %73 = vector.load %arg13[%c0_39, %c0_40] : memref<2x6xf32, #tpu.memory_space<vmem>>, vector<2x6xf32>
    %cst_41 = arith.constant dense<0.000000e+00> : vector<2x128xf32>
    %74 = tpu.matmul %73, %72, %cst_41 {dimension_numbers = #tpu.dot_dimension_numbers<[1], [0], [0], [1], [0, 0, 1, 1], [], []>} : vector<2x6xf32>, vector<6x128xf32>, vector<2x128xf32> -> vector<2x128xf32>
    %c0_42 = arith.constant 0 : index
    %c0_43 = arith.constant 0 : index
    %75 = vector.load %arg14[%c0_42, %c0_43] : memref<2x1xf32, #tpu.memory_space<vmem>>, vector<2x1xf32>
    %76 = vector.broadcast %75 : vector<2x1xf32> to vector<2x128xf32>
    %77 = arith.addf %74, %76 : vector<2x128xf32>
    %c0_44 = arith.constant 0 : index
    %c0_45 = arith.constant 0 : index
    %78 = vector.load %arg15[%c0_44, %c0_45] : memref<2x96xf32, #tpu.memory_space<vmem>>, vector<2x96xf32>
    %cst_46 = arith.constant dense<0.000000e+00> : vector<2x128xf32>
    %79 = tpu.matmul %78, %52, %cst_46 {dimension_numbers = #tpu.dot_dimension_numbers<[1], [0], [0], [1], [0, 0, 1, 1], [], []>} : vector<2x96xf32>, vector<96x128xf32>, vector<2x128xf32> -> vector<2x128xf32>
    %80 = arith.addf %77, %79 : vector<2x128xf32>
    %cst_47 = arith.constant 0.000000e+00 : f32
    %81 = vector.broadcast %cst_47 : f32 to vector<2x128xf32>
    %82 = arith.cmpf oge, %80, %81 : vector<2x128xf32>
    %c0_48 = arith.constant 0 : index
    %c0_49 = arith.constant 0 : index
    %83 = vector.load %arg17[%c0_48, %c0_49] : memref<2x1xf32, #tpu.memory_space<vmem>>, vector<2x1xf32>
    %84 = vector.broadcast %83 : vector<2x1xf32> to vector<2x128xf32>
    %85 = arith.mulf %84, %80 : vector<2x128xf32>
    %86 = arith.select %82, %80, %85 : vector<2x128xi1>, vector<2x128xf32>
    %87 = vector.broadcast %1 : vector<1x128xf32> to vector<2x128xf32>
    %88 = arith.mulf %86, %87 : vector<2x128xf32>
    %cst_50 = arith.constant 0.000000e+00 : f32
    %89 = vector.broadcast %cst_50 : f32 to vector<2x29xf32>
    %90 = vector.extract_strided_slice %88 {offsets = [0, 0], sizes = [2, 99], strides = [1, 1]} : vector<2x128xf32> to vector<2x99xf32>
    %91 = tpu.concatenate %89, %90 in 1 : vector<2x29xf32>, vector<2x99xf32> -> vector<2x128xf32>
    %92 = arith.addf %88, %91 : vector<2x128xf32>
    %c0_51 = arith.constant 0 : index
    %c0_52 = arith.constant 0 : index
    %93 = vector.load %arg0[%c0_51, %c0_52] : memref<1x128xf32, #tpu.memory_space<vmem>>, vector<1x128xf32>
    %cst_53 = arith.constant 0.000000e+00 : f32
    %94 = vector.broadcast %cst_53 : f32 to vector<1x1xf32>
    %95 = vector.extract_strided_slice %93 {offsets = [0, 0], sizes = [1, 127], strides = [1, 1]} : vector<1x128xf32> to vector<1x127xf32>
    %96 = tpu.concatenate %94, %95 in 1 : vector<1x1xf32>, vector<1x127xf32> -> vector<1x128xf32>
    %c0_54 = arith.constant 0 : index
    %c0_55 = arith.constant 0 : index
    %97 = vector.load %arg18[%c0_54, %c0_55] : memref<32x1xf32, #tpu.memory_space<vmem>>, vector<32x1xf32>
    %98 = vector.broadcast %97 : vector<32x1xf32> to vector<32x128xf32>
    %99 = vector.broadcast %96 : vector<1x128xf32> to vector<32x128xf32>
    %100 = arith.mulf %98, %99 : vector<32x128xf32>
    %101 = vector.broadcast %0 : vector<1x128xf32> to vector<32x128xf32>
    %102 = arith.mulf %100, %101 : vector<32x128xf32>
    %103 = arith.mulf %102, %100 : vector<32x128xf32>
    %104 = tpu.concatenate %102, %103 in 0 : vector<32x128xf32>, vector<32x128xf32> -> vector<64x128xf32>
    %cst_56 = arith.constant dense<0.000000e+00> : vector<64xf32>
    %105 = vector.multi_reduction <add>, %104, %cst_56 [1] : vector<64x128xf32> to vector<64xf32>
    %106 = vector.shape_cast %105 : vector<64xf32> to vector<64x1xf32>
    %cst_57 = arith.constant 0.0185185187 : f32
    %107 = vector.broadcast %cst_57 : f32 to vector<64x1xf32>
    %108 = arith.mulf %106, %107 : vector<64x1xf32>
    %109 = vector.extract_strided_slice %108 {offsets = [0, 0], sizes = [32, 1], strides = [1, 1]} : vector<64x1xf32> to vector<32x1xf32>
    %110 = vector.extract_strided_slice %108 {offsets = [32, 0], sizes = [32, 1], strides = [1, 1]} : vector<64x1xf32> to vector<32x1xf32>
    %111 = arith.mulf %109, %109 : vector<32x1xf32>
    %112 = arith.subf %110, %111 : vector<32x1xf32>
    %cst_58 = arith.constant 0.000000e+00 : f32
    %113 = vector.broadcast %cst_58 : f32 to vector<32x1xf32>
    %114 = arith.maximumf %112, %113 : vector<32x1xf32>
    %115 = vector.broadcast %109 : vector<32x1xf32> to vector<32x128xf32>
    %116 = arith.subf %100, %115 : vector<32x128xf32>
    %cst_59 = arith.constant 9.99999974E-6 : f32
    %117 = vector.broadcast %cst_59 : f32 to vector<32x1xf32>
    %118 = arith.addf %114, %117 : vector<32x1xf32>
    %119 = math.rsqrt %118 : vector<32x1xf32>
    %120 = vector.broadcast %119 : vector<32x1xf32> to vector<32x128xf32>
    %121 = arith.mulf %116, %120 : vector<32x128xf32>
    %cst_60 = arith.constant 0.000000e+00 : f32
    %122 = vector.broadcast %cst_60 : f32 to vector<32x128xf32>
    %123 = arith.cmpf oge, %121, %122 : vector<32x128xf32>
    %c0_61 = arith.constant 0 : index
    %c0_62 = arith.constant 0 : index
    %124 = vector.load %arg21[%c0_61, %c0_62] : memref<32x1xf32, #tpu.memory_space<vmem>>, vector<32x1xf32>
    %125 = vector.broadcast %124 : vector<32x1xf32> to vector<32x128xf32>
    %126 = arith.mulf %125, %121 : vector<32x128xf32>
    %127 = arith.select %123, %121, %126 : vector<32x128xi1>, vector<32x128xf32>
    %128 = vector.broadcast %0 : vector<1x128xf32> to vector<32x128xf32>
    %129 = arith.mulf %127, %128 : vector<32x128xf32>
    %cst_63 = arith.constant 0.000000e+00 : f32
    %130 = vector.broadcast %cst_63 : f32 to vector<32x1xf32>
    %131 = vector.extract_strided_slice %129 {offsets = [0, 0], sizes = [32, 127], strides = [1, 1]} : vector<32x128xf32> to vector<32x127xf32>
    %132 = tpu.concatenate %130, %131 in 1 : vector<32x1xf32>, vector<32x127xf32> -> vector<32x128xf32>
    %133 = tpu.concatenate %132, %129 in 0 : vector<32x128xf32>, vector<32x128xf32> -> vector<64x128xf32>
    %c0_64 = arith.constant 0 : index
    %c0_65 = arith.constant 0 : index
    %134 = vector.load %arg19[%c0_64, %c0_65] : memref<32x64xf32, #tpu.memory_space<vmem>>, vector<32x64xf32>
    %cst_66 = arith.constant dense<0.000000e+00> : vector<32x128xf32>
    %135 = tpu.matmul %134, %133, %cst_66 {dimension_numbers = #tpu.dot_dimension_numbers<[1], [0], [0], [1], [0, 0, 1, 1], [], []>} : vector<32x64xf32>, vector<64x128xf32>, vector<32x128xf32> -> vector<32x128xf32>
    %c0_67 = arith.constant 0 : index
    %c0_68 = arith.constant 0 : index
    %136 = vector.load %arg20[%c0_67, %c0_68] : memref<32x1xf32, #tpu.memory_space<vmem>>, vector<32x1xf32>
    %137 = vector.broadcast %136 : vector<32x1xf32> to vector<32x128xf32>
    %138 = vector.broadcast %96 : vector<1x128xf32> to vector<32x128xf32>
    %139 = arith.mulf %137, %138 : vector<32x128xf32>
    %140 = arith.addf %135, %139 : vector<32x128xf32>
    %141 = vector.broadcast %0 : vector<1x128xf32> to vector<32x128xf32>
    %142 = arith.mulf %140, %141 : vector<32x128xf32>
    %143 = arith.mulf %142, %140 : vector<32x128xf32>
    %144 = tpu.concatenate %142, %143 in 0 : vector<32x128xf32>, vector<32x128xf32> -> vector<64x128xf32>
    %cst_69 = arith.constant dense<0.000000e+00> : vector<64xf32>
    %145 = vector.multi_reduction <add>, %144, %cst_69 [1] : vector<64x128xf32> to vector<64xf32>
    %146 = vector.shape_cast %145 : vector<64xf32> to vector<64x1xf32>
    %cst_70 = arith.constant 0.0185185187 : f32
    %147 = vector.broadcast %cst_70 : f32 to vector<64x1xf32>
    %148 = arith.mulf %146, %147 : vector<64x1xf32>
    %149 = vector.extract_strided_slice %148 {offsets = [0, 0], sizes = [32, 1], strides = [1, 1]} : vector<64x1xf32> to vector<32x1xf32>
    %150 = vector.extract_strided_slice %148 {offsets = [32, 0], sizes = [32, 1], strides = [1, 1]} : vector<64x1xf32> to vector<32x1xf32>
    %151 = arith.mulf %149, %149 : vector<32x1xf32>
    %152 = arith.subf %150, %151 : vector<32x1xf32>
    %cst_71 = arith.constant 0.000000e+00 : f32
    %153 = vector.broadcast %cst_71 : f32 to vector<32x1xf32>
    %154 = arith.maximumf %152, %153 : vector<32x1xf32>
    %155 = vector.broadcast %149 : vector<32x1xf32> to vector<32x128xf32>
    %156 = arith.subf %140, %155 : vector<32x128xf32>
    %cst_72 = arith.constant 9.99999974E-6 : f32
    %157 = vector.broadcast %cst_72 : f32 to vector<32x1xf32>
    %158 = arith.addf %154, %157 : vector<32x1xf32>
    %159 = math.rsqrt %158 : vector<32x1xf32>
    %160 = vector.broadcast %159 : vector<32x1xf32> to vector<32x128xf32>
    %161 = arith.mulf %156, %160 : vector<32x128xf32>
    %cst_73 = arith.constant 0.000000e+00 : f32
    %162 = vector.broadcast %cst_73 : f32 to vector<32x128xf32>
    %163 = arith.cmpf oge, %161, %162 : vector<32x128xf32>
    %c0_74 = arith.constant 0 : index
    %c0_75 = arith.constant 0 : index
    %164 = vector.load %arg22[%c0_74, %c0_75] : memref<32x1xf32, #tpu.memory_space<vmem>>, vector<32x1xf32>
    %165 = vector.broadcast %164 : vector<32x1xf32> to vector<32x128xf32>
    %166 = arith.mulf %165, %161 : vector<32x128xf32>
    %167 = arith.select %163, %161, %166 : vector<32x128xi1>, vector<32x128xf32>
    %168 = vector.broadcast %0 : vector<1x128xf32> to vector<32x128xf32>
    %169 = arith.mulf %167, %168 : vector<32x128xf32>
    %cst_76 = arith.constant 0.000000e+00 : f32
    %170 = vector.broadcast %cst_76 : f32 to vector<32x1xf32>
    %171 = vector.extract_strided_slice %169 {offsets = [0, 0], sizes = [32, 127], strides = [1, 1]} : vector<32x128xf32> to vector<32x127xf32>
    %172 = tpu.concatenate %170, %171 in 1 : vector<32x1xf32>, vector<32x127xf32> -> vector<32x128xf32>
    %173 = tpu.concatenate %172, %169 in 0 : vector<32x128xf32>, vector<32x128xf32> -> vector<64x128xf32>
    %cst_77 = arith.constant 0.000000e+00 : f32
    %174 = vector.broadcast %cst_77 : f32 to vector<2x1xf32>
    %175 = vector.extract_strided_slice %92 {offsets = [0, 0], sizes = [2, 127], strides = [1, 1]} : vector<2x128xf32> to vector<2x127xf32>
    %176 = tpu.concatenate %174, %175 in 1 : vector<2x1xf32>, vector<2x127xf32> -> vector<2x128xf32>
    %177 = tpu.concatenate %176, %92 in 0 : vector<2x128xf32>, vector<2x128xf32> -> vector<4x128xf32>
    %c0_78 = arith.constant 0 : index
    %c0_79 = arith.constant 0 : index
    %178 = vector.load %arg23[%c0_78, %c0_79] : memref<32x64xf32, #tpu.memory_space<vmem>>, vector<32x64xf32>
    %cst_80 = arith.constant dense<0.000000e+00> : vector<32x128xf32>
    %179 = tpu.matmul %178, %173, %cst_80 {dimension_numbers = #tpu.dot_dimension_numbers<[1], [0], [0], [1], [0, 0, 1, 1], [], []>} : vector<32x64xf32>, vector<64x128xf32>, vector<32x128xf32> -> vector<32x128xf32>
    %c0_81 = arith.constant 0 : index
    %c0_82 = arith.constant 0 : index
    %180 = vector.load %arg24[%c0_81, %c0_82] : memref<32x4xf32, #tpu.memory_space<vmem>>, vector<32x4xf32>
    %cst_83 = arith.constant dense<0.000000e+00> : vector<32x128xf32>
    %181 = tpu.matmul %180, %177, %cst_83 {dimension_numbers = #tpu.dot_dimension_numbers<[1], [0], [0], [1], [0, 0, 1, 1], [], []>} : vector<32x4xf32>, vector<4x128xf32>, vector<32x128xf32> -> vector<32x128xf32>
    %182 = arith.addf %179, %181 : vector<32x128xf32>
    %183 = vector.broadcast %0 : vector<1x128xf32> to vector<32x128xf32>
    %184 = arith.mulf %182, %183 : vector<32x128xf32>
    %185 = arith.mulf %184, %182 : vector<32x128xf32>
    %186 = tpu.concatenate %184, %185 in 0 : vector<32x128xf32>, vector<32x128xf32> -> vector<64x128xf32>
    %cst_84 = arith.constant dense<0.000000e+00> : vector<64xf32>
    %187 = vector.multi_reduction <add>, %186, %cst_84 [1] : vector<64x128xf32> to vector<64xf32>
    %188 = vector.shape_cast %187 : vector<64xf32> to vector<64x1xf32>
    %cst_85 = arith.constant 0.0185185187 : f32
    %189 = vector.broadcast %cst_85 : f32 to vector<64x1xf32>
    %190 = arith.mulf %188, %189 : vector<64x1xf32>
    %191 = vector.extract_strided_slice %190 {offsets = [0, 0], sizes = [32, 1], strides = [1, 1]} : vector<64x1xf32> to vector<32x1xf32>
    %192 = vector.extract_strided_slice %190 {offsets = [32, 0], sizes = [32, 1], strides = [1, 1]} : vector<64x1xf32> to vector<32x1xf32>
    %193 = arith.mulf %191, %191 : vector<32x1xf32>
    %194 = arith.subf %192, %193 : vector<32x1xf32>
    %cst_86 = arith.constant 0.000000e+00 : f32
    %195 = vector.broadcast %cst_86 : f32 to vector<32x1xf32>
    %196 = arith.maximumf %194, %195 : vector<32x1xf32>
    %197 = vector.broadcast %191 : vector<32x1xf32> to vector<32x128xf32>
    %198 = arith.subf %182, %197 : vector<32x128xf32>
    %cst_87 = arith.constant 9.99999974E-6 : f32
    %199 = vector.broadcast %cst_87 : f32 to vector<32x1xf32>
    %200 = arith.addf %196, %199 : vector<32x1xf32>
    %201 = math.rsqrt %200 : vector<32x1xf32>
    %202 = vector.broadcast %201 : vector<32x1xf32> to vector<32x128xf32>
    %203 = arith.mulf %198, %202 : vector<32x128xf32>
    %cst_88 = arith.constant 0.000000e+00 : f32
    %204 = vector.broadcast %cst_88 : f32 to vector<32x128xf32>
    %205 = arith.cmpf oge, %203, %204 : vector<32x128xf32>
    %c0_89 = arith.constant 0 : index
    %c0_90 = arith.constant 0 : index
    %206 = vector.load %arg28[%c0_89, %c0_90] : memref<32x1xf32, #tpu.memory_space<vmem>>, vector<32x1xf32>
    %207 = vector.broadcast %206 : vector<32x1xf32> to vector<32x128xf32>
    %208 = arith.mulf %207, %203 : vector<32x128xf32>
    %209 = arith.select %205, %203, %208 : vector<32x128xi1>, vector<32x128xf32>
    %210 = vector.broadcast %0 : vector<1x128xf32> to vector<32x128xf32>
    %211 = arith.mulf %209, %210 : vector<32x128xf32>
    %c0_91 = arith.constant 0 : index
    %c0_92 = arith.constant 0 : index
    %212 = vector.load %arg26[%c0_91, %c0_92] : memref<32x64xf32, #tpu.memory_space<vmem>>, vector<32x64xf32>
    %cst_93 = arith.constant dense<0.000000e+00> : vector<32x128xf32>
    %213 = tpu.matmul %212, %173, %cst_93 {dimension_numbers = #tpu.dot_dimension_numbers<[1], [0], [0], [1], [0, 0, 1, 1], [], []>} : vector<32x64xf32>, vector<64x128xf32>, vector<32x128xf32> -> vector<32x128xf32>
    %c0_94 = arith.constant 0 : index
    %c0_95 = arith.constant 0 : index
    %214 = vector.load %arg27[%c0_94, %c0_95] : memref<32x4xf32, #tpu.memory_space<vmem>>, vector<32x4xf32>
    %cst_96 = arith.constant dense<0.000000e+00> : vector<32x128xf32>
    %215 = tpu.matmul %214, %177, %cst_96 {dimension_numbers = #tpu.dot_dimension_numbers<[1], [0], [0], [1], [0, 0, 1, 1], [], []>} : vector<32x4xf32>, vector<4x128xf32>, vector<32x128xf32> -> vector<32x128xf32>
    %216 = arith.addf %213, %215 : vector<32x128xf32>
    %cst_97 = arith.constant 0.000000e+00 : f32
    %217 = vector.broadcast %cst_97 : f32 to vector<32x1xf32>
    %218 = vector.extract_strided_slice %211 {offsets = [0, 0], sizes = [32, 127], strides = [1, 1]} : vector<32x128xf32> to vector<32x127xf32>
    %219 = tpu.concatenate %217, %218 in 1 : vector<32x1xf32>, vector<32x127xf32> -> vector<32x128xf32>
    %220 = tpu.concatenate %219, %211 in 0 : vector<32x128xf32>, vector<32x128xf32> -> vector<64x128xf32>
    %c0_98 = arith.constant 0 : index
    %c0_99 = arith.constant 0 : index
    %221 = vector.load %arg25[%c0_98, %c0_99] : memref<32x64xf32, #tpu.memory_space<vmem>>, vector<32x64xf32>
    %cst_100 = arith.constant dense<0.000000e+00> : vector<32x128xf32>
    %222 = tpu.matmul %221, %220, %cst_100 {dimension_numbers = #tpu.dot_dimension_numbers<[1], [0], [0], [1], [0, 0, 1, 1], [], []>} : vector<32x64xf32>, vector<64x128xf32>, vector<32x128xf32> -> vector<32x128xf32>
    %223 = arith.addf %222, %216 : vector<32x128xf32>
    %224 = vector.broadcast %0 : vector<1x128xf32> to vector<32x128xf32>
    %225 = arith.mulf %223, %224 : vector<32x128xf32>
    %226 = arith.mulf %225, %223 : vector<32x128xf32>
    %227 = tpu.concatenate %225, %226 in 0 : vector<32x128xf32>, vector<32x128xf32> -> vector<64x128xf32>
    %cst_101 = arith.constant dense<0.000000e+00> : vector<64xf32>
    %228 = vector.multi_reduction <add>, %227, %cst_101 [1] : vector<64x128xf32> to vector<64xf32>
    %229 = vector.shape_cast %228 : vector<64xf32> to vector<64x1xf32>
    %cst_102 = arith.constant 0.0185185187 : f32
    %230 = vector.broadcast %cst_102 : f32 to vector<64x1xf32>
    %231 = arith.mulf %229, %230 : vector<64x1xf32>
    %232 = vector.extract_strided_slice %231 {offsets = [0, 0], sizes = [32, 1], strides = [1, 1]} : vector<64x1xf32> to vector<32x1xf32>
    %233 = vector.extract_strided_slice %231 {offsets = [32, 0], sizes = [32, 1], strides = [1, 1]} : vector<64x1xf32> to vector<32x1xf32>
    %234 = arith.mulf %232, %232 : vector<32x1xf32>
    %235 = arith.subf %233, %234 : vector<32x1xf32>
    %cst_103 = arith.constant 0.000000e+00 : f32
    %236 = vector.broadcast %cst_103 : f32 to vector<32x1xf32>
    %237 = arith.maximumf %235, %236 : vector<32x1xf32>
    %238 = vector.broadcast %232 : vector<32x1xf32> to vector<32x128xf32>
    %239 = arith.subf %223, %238 : vector<32x128xf32>
    %cst_104 = arith.constant 9.99999974E-6 : f32
    %240 = vector.broadcast %cst_104 : f32 to vector<32x1xf32>
    %241 = arith.addf %237, %240 : vector<32x1xf32>
    %242 = math.rsqrt %241 : vector<32x1xf32>
    %243 = vector.broadcast %242 : vector<32x1xf32> to vector<32x128xf32>
    %244 = arith.mulf %239, %243 : vector<32x128xf32>
    %cst_105 = arith.constant 0.000000e+00 : f32
    %245 = vector.broadcast %cst_105 : f32 to vector<32x128xf32>
    %246 = arith.cmpf oge, %244, %245 : vector<32x128xf32>
    %c0_106 = arith.constant 0 : index
    %c0_107 = arith.constant 0 : index
    %247 = vector.load %arg29[%c0_106, %c0_107] : memref<32x1xf32, #tpu.memory_space<vmem>>, vector<32x1xf32>
    %248 = vector.broadcast %247 : vector<32x1xf32> to vector<32x128xf32>
    %249 = arith.mulf %248, %244 : vector<32x128xf32>
    %250 = arith.select %246, %244, %249 : vector<32x128xi1>, vector<32x128xf32>
    %251 = vector.broadcast %0 : vector<1x128xf32> to vector<32x128xf32>
    %252 = arith.mulf %250, %251 : vector<32x128xf32>
    %cst_108 = arith.constant 0.000000e+00 : f32
    %253 = vector.broadcast %cst_108 : f32 to vector<32x1xf32>
    %254 = vector.extract_strided_slice %252 {offsets = [0, 0], sizes = [32, 127], strides = [1, 1]} : vector<32x128xf32> to vector<32x127xf32>
    %255 = tpu.concatenate %253, %254 in 1 : vector<32x1xf32>, vector<32x127xf32> -> vector<32x128xf32>
    %256 = tpu.concatenate %255, %252 in 0 : vector<32x128xf32>, vector<32x128xf32> -> vector<64x128xf32>
    %c0_109 = arith.constant 0 : index
    %c0_110 = arith.constant 0 : index
    %257 = vector.load %arg30[%c0_109, %c0_110] : memref<2x64xf32, #tpu.memory_space<vmem>>, vector<2x64xf32>
    %cst_111 = arith.constant dense<0.000000e+00> : vector<2x128xf32>
    %258 = tpu.matmul %257, %256, %cst_111 {dimension_numbers = #tpu.dot_dimension_numbers<[1], [0], [0], [1], [0, 0, 1, 1], [], []>} : vector<2x64xf32>, vector<64x128xf32>, vector<2x128xf32> -> vector<2x128xf32>
    %259 = vector.extract_strided_slice %258 {offsets = [0, 0], sizes = [1, 128], strides = [1, 1]} : vector<2x128xf32> to vector<1x128xf32>
    %260 = vector.extract_strided_slice %258 {offsets = [1, 0], sizes = [1, 128], strides = [1, 1]} : vector<2x128xf32> to vector<1x128xf32>
    %cst_112 = arith.constant 9.99999993E-9 : f32
    %261 = vector.broadcast %cst_112 : f32 to vector<1x128xf32>
    %262 = arith.maximumf %260, %261 : vector<1x128xf32>
    %263 = arith.mulf %262, %93 : vector<1x128xf32>
    %264 = arith.addf %259, %263 : vector<1x128xf32>
    %c0_113 = arith.constant 0 : index
    %c0_114 = arith.constant 0 : index
    %265 = vector.load %arg31[%c0_113, %c0_114] : memref<2x128xf32, #tpu.memory_space<vmem>>, vector<1x128xf32>
    tpu.vector_store %arg31[%c0_113, %c0_114], %264 {strides = array<i32>} : memref<2x128xf32, #tpu.memory_space<vmem>>, vector<1x128xf32>,
    %266 = math.log %262 : vector<1x128xf32>
    %cst_115 = arith.constant 0.000000e+00 : f32
    %267 = vector.broadcast %cst_115 : f32 to vector<1x128xf32>
    %268 = arith.subf %267, %266 : vector<1x128xf32>
    %c1 = arith.constant 1 : index
    %c0_116 = arith.constant 0 : index
    %269 = vector.load %arg31[%c1, %c0_116] : memref<2x128xf32, #tpu.memory_space<vmem>>, vector<1x128xf32>
    tpu.vector_store %arg31[%c1, %c0_116], %268 {strides = array<i32>} : memref<2x128xf32, #tpu.memory_space<vmem>>, vector<1x128xf32>,
    return
  }
}

</mosaic_0001>

<bundles_post_ra>
// kernel: forward.2
= control target key start
LH: loop header
LB: loop body
LE: loop exit
PB: predicated region body
PF: predicated region fallthrough
CT: control target
= control target key end

     0   :  { %s2795_s3 = smov 1   ;;  %s2796_s7 = smov 4   ;;  %vm181_vm0 = vcmask 48128   ;;  %v2798_v2 = vmov 0   ;;  %vm142_vm1 = vcmask 1039360   ;;  %vm137_vm2 = vcmask 7168   ;;  %s3453_s0 = inlined_call_operand.smem [shape: u32[32], index: -1, kind: input, shape index: {}] }
   0x1   :  { %s2218_s6 = sld [smem:[%s3453_s0 + %s2795_s3]]   ;;  %s2797_s11 = smov 127   ;;  %2757 = vset.pattern.permute.xlu1 %v2798_v2  ;;  %2758 = vset.pattern.permute.xlu0 %v2798_v2  ;;  %vm149_vm3 = vcmask 1041408   ;;  %vm151_vm4 = vcmask 1043456   ;;  %vm194_vm5 = vcmask 1045504   ;;  %vm393_vm10 = vcmask 785408   ;;  %vm2914_vm11 = vmneg %vm137_vm2 }
   0x2   :  { %s2842_s10 = sld [smem:[%s3453_s0 + %s2796_s7]]   ;;  %s2799_s12 = smov 5  }
   0x3   :  { %s2222_s15 = sld [smem:[%s3453_s0 + %s2799_s12]]   ;;  %s2800_s16 = smov 9  }
   0x4   :  { %s2226_s19 = sld [smem:[%s3453_s0 + %s2800_s16]]   ;;  %s2801_s20 = smov 3  }
   0x5   :  { %s2220_s23 = sld [smem:[%s3453_s0 + %s2801_s20]]   ;;  %s2802_s24 = smov 6  }
   0x6   :  { %s2881_s27 = sld [smem:[%s3453_s0 + %s2802_s24]]   ;;  %s2803_s28 = smov 8  }
   0x7   :  { %v132_v0 = vld [vmem:[%s2218_s6] sm:$0x3]  ;;  %s2225_s1 = sld [smem:[%s3453_s0 + %s2803_s28]]   ;;  %s2804_s2 = smov 7  }
   0x8   :  { %139 = vrot.lane.b32.xlu0 %v132_v0, %s2797_s11  ;;  %v153_v1 = vld [vmem:[%s2842_s10] sm:$0xff]  ;;  %v144_v12 = vrot.slane %v132_v0, 6  ;;  %v154_v19 = vld [vmem:[%s2842_s10 + $0x8] sm:$0xff]  ;;  %v155_v20 = vld [vmem:[%s2842_s10 + $0x10] sm:$0xff]  ;;  %s2224_s6 = sld [smem:[%s3453_s0 + %s2804_s2]]   ;;  %s2805_s7 = smov 10  }
   0x9   :  { %2496 = vmatprep.mubr.msk.f32.mxu1 %vm181_vm0, %v153_v1  ;;  %v160_v3 = vld [vmem:[%s2222_s15 + $0x18] sm:$0xff]  ;;  %v159_v5 = vld [vmem:[%s2222_s15 + $0x10] sm:$0xff]  ;;  %v157_v6 = vld [vmem:[%s2222_s15] sm:$0xff]  ;;  %s2807_s12 = smov 18   ;;  %s2970_s18 = sld [smem:[%s3453_s0]]  }
   0xa   :  { %178 = vperm.xlu1 %2757, %v160_v3   ;;  %v290_v4 = vld [vmem:[%s2226_s19 + $0x18] sm:$0xff]  ;;  %v158_v7 = vld [vmem:[%s2222_s15 + $0x8] sm:$0xff]  ;;  %v287_v8 = vld [vmem:[%s2226_s19] sm:$0xff]  ;;  %s2235_s15 = sld [smem:[%s3453_s0 + %s2807_s12]]   ;;  %s2816_s20 = smov 17  }
   0xb   :  { %v289_v9 = vld [vmem:[%s2226_s19 + $0x10] sm:$0xff]  ;;  %v288_v10 = vld [vmem:[%s2226_s19 + $0x8] sm:$0xff]  ;;  %v156_v21 = vld [vmem:[%s2842_s10 + $0x18] sm:$0xff]  ;;  %s2227_s10 = sld [smem:[%s3453_s0 + %s2805_s7]]   ;;  %s2809_s19 = smov 11  }
   0xc   :  { %134 = vrot.lane.b32.xlu0 %v132_v0, %s2795_s3  ;;  %v2871_v40 = vld [vmem:[%s2220_s23] ss:$0 sm:$0xff]  ;;  %s2228_s22 = sld [smem:[%s3453_s0 + %s2809_s19]]   ;;  %s2810_s23 = smov 2  }
   0xd   :  { %v365_v51 = vld [vmem:[%s2881_s27] sm:$0xff]  ;;  %v492_v53 = vld [vmem:[%s2225_s1 + $0x8] sm:$0xff]  ;;  %v493_v55 = vld [vmem:[%s2225_s1 + $0x10] sm:$0xff]  ;;  %s3024_s26 = sld [smem:[%s3453_s0 + %s2810_s23]]   ;;  %s2817_s24 = smov 14  }
   0xe   :  { %173 = vperm.xlu1 %2757, %v159_v5   ;;  %v491_v52 = vld [vmem:[%s2225_s1] sm:$0xff]  ;;  %v372_v54 = vld [vmem:[%s2224_s6 + $0x18] sm:$0xff]  ;;  %v371_v57 = vld [vmem:[%s2224_s6 + $0x10] sm:$0xff]  ;;  %s2234_s23 = sld [smem:[%s3453_s0 + %s2816_s20]]   ;;  %s2819_s2 = smov 15  }
   0xf   :  { %2534 = vmatprep.mubr.msk.f32.mxu0 %vm181_vm0, %v491_v52  ;;  %v494_v56 = vld [vmem:[%s2225_s1 + $0x18] sm:$0xff]  ;;  %v370_v58 = vld [vmem:[%s2224_s6 + $0x8] sm:$0xff]  ;;  %v369_v60 = vld [vmem:[%s2224_s6] sm:$0xff]  ;;  %s2812_s1 = smov 16   ;;  %s2813_s6 = smov 12  }
  0x10   :  { %308 = vperm.xlu0 %2758, %v290_v4   ;;  %v965_v52 = vld [vmem:[%s2235_s15 + $0x10] sm:$0xff]  ;;  %s2233_s5 = sld [smem:[%s3453_s0 + %s2812_s1]]   ;;  %s2820_s7 = smov 22  }
  0x11   :  { %v603_v59 = vld [vmem:[%s2227_s10 + $0x18] sm:$0xff]  ;;  %v602_v61 = vld [vmem:[%s2227_s10 + $0x10] sm:$0xff]  ;;  %v601_v62 = vld [vmem:[%s2227_s10 + $0x8] sm:$0xff]  ;;  %s2229_s9 = sld [smem:[%s3453_s0 + %s2813_s6]]   ;;  %s2821_s12 = smov 29  }
  0x12   :  { %168 = vperm.xlu1 %2757, %v158_v7   ;;  %v600_v63 = vld [vmem:[%s2227_s10] sm:$0xff]  ;;  %s2814_s10 = smov 19   ;;  %s2231_s28 = sld [smem:[%s3453_s0 + %s2817_s24]]  }
  0x13   :  { %s3087_s14 = sld [smem:[%s3453_s0 + %s2814_s10]]   ;;  %s2822_s13 = smov 23  }
  0x14   :  { %163 = vperm.xlu0 %2758, %v157_v6   ;;  %s2232_s6 = sld [smem:[%s3453_s0 + %s2819_s2]]   ;;  %s2823_s17 = smov 24  }
  0x15   :  { %s2239_s10 = sld [smem:[%s3453_s0 + %s2820_s7]]  }
  0x16   :  { %303 = vperm.xlu1 %2757, %v289_v9   ;;  %v366_v9 = vld [vmem:[%s2881_s27 + $0x8] sm:$0xff]  ;;  %s3242_s16 = sld [smem:[%s3453_s0 + %s2822_s13]]  }
  0x17   :  { %s3247_s21 = sld [smem:[%s3453_s0 + %s2823_s17]]  }
  0x18   :  { %293 = vperm.xlu0 %2758, %v287_v8  }
  0x1a   :  { %298 = vperm.xlu1 %2757, %v288_v10   ;;  %v367_v10 = vld [vmem:[%s2881_s27 + $0x10] sm:$0xff] }
  0x7a   :  { %v140_v11 = vpop.permute.xlu0 %139 }
  0x7b   :  { %v143_v13 = vsel %vm142_vm1, %v140_v11, 0.0  ;;  %v368_v11 = vld [vmem:[%s2881_s27 + $0x18] sm:$0xff]  ;;  %s2811_s27 = smov 21  }
  0x7c   :  { %v147_v15 = vrot.slane %v143_v13, 4  ;;  %s2238_s30 = sld [smem:[%s3453_s0 + %s2811_s27]]   ;;  %s2825_s27 = smov 28  }
  0x7d   :  { %s2245_s29 = sld [smem:[%s3453_s0 + %s2825_s27]]  }
  0x7e   :  { %v135_v14 = vpop.permute.xlu0 %134 }
  0x7f   :  { %v138_v16 = vsel %vm137_vm2, 0.0, %v135_v14 }
  0x80   :  { %v150_v17 = vsel %vm149_vm3, %v138_v16, %v144_v12  ;;  %v2806_v12 = vmov 0.0  }
  0x81   :  { %v152_v18 = vsel %vm151_vm4, %v150_v17, %v147_v15 }
  0x82   :  { %2494 = vmatprep.subr.msk.mxu1 %vm194_vm5, %v152_v18  ;;  %2532 = vmatprep.subr.msk.mxu0 %vm194_vm5, %v152_v18 }
  0x83   :  { %2495 = vmatpush3.msk.msra.mxu1 %vm194_vm5, %v152_v18  ;;  %2533 = vmatpush3.msk.msra.mxu0 %vm194_vm5, %v152_v18 }
  0x84   :  { %2497 = vmatmul.mubr.msk.f32.vlgmr.msra.gmra.mxu1 %vm181_vm0, %v154_v19  ;;  %2535 = vmatmul.mubr.msk.f32.vlgmr.msra.gmra.mxu0 %vm181_vm0, %v492_v53  ;;  %v964_v53 = vld [vmem:[%s2235_s15 + $0x8] sm:$0xff] }
  0x85   :  { %2499 = vmatprep.mubr.msk.f32.mxu1 %vm181_vm0, %v155_v20  ;;  %v179_v22 = vpop.permute.xlu1 %178  ;;  %2537 = vmatprep.mubr.msk.f32.mxu0 %vm181_vm0, %v493_v55 }
  0x86   :  { %2540 = vmatprep.subr.mxu0 %v2806_v12 }
  0x88   :  { %2500 = vmatmul.mubr.msk.f32.gmra.mxu1 %vm181_vm0, %v156_v21  ;;  %2538 = vmatmul.mubr.msk.f32.gmra.mxu0 %vm181_vm0, %v494_v56 }
  0x89   :  { %v174_v23 = vpop.permute.xlu1 %173  ;;  %2526 = vmatprep.mubr.msk.f32.mxu1 %vm393_vm10, %v365_v51  ;;  %v2304_v51 = vld [vmem:[%s2970_s18] ss:$0 sm:$0xff] }
  0x8b   :  { %v309_v25 = vpop.permute.xlu0 %308 }
  0x8d   :  { %v169_v24 = vpop.permute.xlu1 %168 }
  0x8f   :  { %v164_v27 = vpop.permute.xlu0 %163 }
  0x91   :  { %v304_v26 = vpop.permute.xlu1 %303 }
  0x93   :  { %v294_v35 = vpop.permute.xlu0 %293 }
  0x95   :  { %v299_v32 = vpop.permute.xlu1 %298 }
 0x144   :  { %v2498_v28 = vpop.f32.mrf.mxu1  ;;  %v2536_v16 = vpop.f32.mrf.mxu0 }
 0x145   :  { %v270_v30 = vadd.f32 %v2498_v28, %v169_v24 }
 0x146   :  { %v264_v29 = vpop.f32.mrf.mxu1  ;;  %v573_v20 = vpop.f32.mrf.mxu0 }
 0x147   :  { %v265_v33 = vadd.f32 %v264_v29, %v164_v27  ;;  %v312_v37 = vmul.f32 %v299_v32, %v270_v30  ;;  %vm284_vm7 = vcmp.ge.f32.partialorder %v270_v30, 0.0 }
 0x148   :  { %v2501_v31 = vpop.f32.mrf.mxu1  ;;  %v2539_v28 = vpop.f32.mrf.mxu0 }
 0x149   :  { %v280_v34 = vadd.f32 %v2501_v31, %v179_v22  ;;  %v311_v41 = vmul.f32 %v294_v35, %v265_v33  ;;  %vm283_vm9 = vcmp.ge.f32.partialorder %v265_v33, 0.0  ;;  %v316_v45 = vsel %vm284_vm7, %v270_v30, %v312_v37 }
 0x14a   :  { %v274_v36 = vpop.f32.mrf.mxu1  ;;  %v326_v49 = vmul.f32 %v2871_v40, %v316_v45 }
 0x14b   :  { %vm286_vm6 = vcmp.ge.f32.partialorder %v280_v34, 0.0  ;;  %v314_v38 = vmul.f32 %v309_v25, %v280_v34  ;;  %v275_v39 = vadd.f32 %v274_v36, %v174_v23  ;;  %v315_v48 = vsel %vm283_vm9, %v265_v33, %v311_v41  ;;  %v583_v36 = vpop.f32.mrf.mxu0 }
 0x14c   :  { %v325_v50 = vmul.f32 %v2871_v40, %v315_v48  ;;  %vm1153_vm9 = vcmask 523264  }
 0x14d   :  { %v318_v42 = vsel %vm286_vm6, %v280_v34, %v314_v38  ;;  %vm285_vm8 = vcmp.ge.f32.partialorder %v275_v39, 0.0  ;;  %v313_v43 = vmul.f32 %v304_v26, %v275_v39  ;;  %vm2808_vm6 = vmmov 0  }
 0x14e   :  { %v328_v44 = vmul.f32 %v2871_v40, %v318_v42  ;;  %2564 = vmatprep.mubr.msk.f32.mxu0 %vm2808_vm6, %v2806_v12 }
 0x14f   :  { %v317_v46 = vsel %vm285_vm8, %v275_v39, %v313_v43 }
 0x150   :  { %v327_v47 = vmul.f32 %v2871_v40, %v317_v46  ;;  %355 = vrot.lane.b32.xlu1 %v328_v44, %s2797_s11 }
 0x152   :  { %353 = vrot.lane.b32.xlu0 %v327_v47, %s2797_s11 }
 0x154   :  { %351 = vrot.lane.b32.xlu1 %v326_v49, %s2797_s11 }
 0x156   :  { %349 = vrot.lane.b32.xlu0 %v325_v50, %s2797_s11 }
 0x158   :  { %339 = vrot.lane.b32.xlu1 %v328_v44, %s2795_s3 }
 0x15a   :  { %337 = vrot.lane.b32.xlu0 %v327_v47, %s2795_s3 }
 0x15c   :  { %335 = vrot.lane.b32.xlu1 %v326_v49, %s2795_s3 }
 0x15e   :  { %333 = vrot.lane.b32.xlu0 %v325_v50, %s2795_s3 }
 0x160   :  { %390 = vperm.xlu1 %2757, %v372_v54   ;;  %v963_v54 = vld [vmem:[%s2235_s15] sm:$0xff] }
 0x162   :  { %385 = vperm.xlu0 %2758, %v371_v57  }
 0x164   :  { %380 = vperm.xlu1 %2757, %v370_v58  }
 0x166   :  { %621 = vperm.xlu0 %2758, %v603_v59  }
 0x168   :  { %375 = vperm.xlu1 %2757, %v369_v60   ;;  %v987_v60 = vlaneseq }
 0x16a   :  { %616 = vperm.xlu0 %2758, %v602_v61  }
 0x16c   :  { %611 = vperm.xlu1 %2757, %v601_v62  }
 0x16e   :  { %606 = vperm.xlu0 %2758, %v600_v63   ;;  %v988_v63 = vshrl.u32 %v987_v60, 7 }
 0x1c2   :  { %v356_v0 = vpop.permute.xlu1 %355 }
 0x1c3   :  { %2502 = vmatprep.subr.msk.mxu1 %vm142_vm1, %v356_v0 }
 0x1c4   :  { %2503 = vmatpush3.msk.msra.mxu1 %vm142_vm1, %v356_v0  ;;  %v354_v1 = vpop.permute.xlu0 %353 }
 0x1c5   :  { %2504 = vmatprep.subr.msk.mxu1 %vm142_vm1, %v354_v1 }
 0x1c6   :  { %v352_v2 = vpop.permute.xlu1 %351  ;;  %2505 = vmatpush3.msk.msra.mxu1 %vm142_vm1, %v354_v1  ;;  %v989_v1 = vsub.s32 0, %v988_v63 }
 0x1c7   :  { %2506 = vmatprep.subr.msk.mxu1 %vm142_vm1, %v352_v2 }
 0x1c8   :  { %2507 = vmatpush3.msk.msra.mxu1 %vm142_vm1, %v352_v2  ;;  %v350_v3 = vpop.permute.xlu0 %349 }
 0x1c9   :  { %2508 = vmatprep.subr.msk.mxu1 %vm142_vm1, %v350_v3 }
 0x1ca   :  { %2509 = vmatpush3.msk.msra.mxu1 %vm142_vm1, %v350_v3  ;;  %v340_v5 = vpop.permute.xlu1 %339 }
 0x1cb   :  { %2510 = vmatprep.subr.mxu1 %v328_v44 }
 0x1cc   :  { %2511 = vmatpush3.msra.mxu1 %v328_v44  ;;  %v338_v6 = vpop.permute.xlu0 %337 }
 0x1cd   :  { %2512 = vmatprep.subr.mxu1 %v327_v47 }
 0x1ce   :  { %2513 = vmatpush3.msra.mxu1 %v327_v47  ;;  %v336_v7 = vpop.permute.xlu1 %335 }
 0x1cf   :  { %2514 = vmatprep.subr.mxu1 %v326_v49 }
 0x1d0   :  { %2515 = vmatpush3.msra.mxu1 %v326_v49  ;;  %v334_v8 = vpop.permute.xlu0 %333 }
 0x1d1   :  { %2516 = vmatprep.subr.mxu1 %v325_v50 }
 0x1d2   :  { %2517 = vmatpush3.msra.mxu1 %v325_v50  ;;  %v966_v50 = vld [vmem:[%s2235_s15 + $0x18] sm:$0xff]  ;;  %s2815_s15 = smov 20  }
 0x1d3   :  { %2518 = vmatprep.subr.msk.mxu1 %vm2914_vm11, %v340_v5  ;;  %s2237_s19 = sld [smem:[%s3453_s0 + %s2815_s15]]  }
 0x1d4   :  { %2519 = vmatpush3.msk.msra.mxu1 %vm2914_vm11, %v340_v5  ;;  %v672_v5 = vld [vmem:[%s2228_s22] sm:$0x3]  ;;  %s2824_s22 = smov 27  }
 0x1d5   :  { %2520 = vmatprep.subr.msk.mxu1 %vm2914_vm11, %v338_v6  ;;  %s3275_s25 = sld [smem:[%s3453_s0 + %s2824_s22]]  }
 0x1d6   :  { %2521 = vmatpush3.msk.msra.mxu1 %vm2914_vm11, %v338_v6 }
 0x1d7   :  { %2522 = vmatprep.subr.msk.mxu1 %vm2914_vm11, %v336_v7 }
 0x1d8   :  { %2523 = vmatpush3.msk.msra.mxu1 %vm2914_vm11, %v336_v7 }
 0x1d9   :  { %2524 = vmatprep.subr.msk.mxu1 %vm2914_vm11, %v334_v8 }
 0x1da   :  { %2525 = vmatpush3.msk.msra.mxu1 %vm2914_vm11, %v334_v8  ;;  %v3048_v8 = vld [vmem:[%s3024_s26] ss:$0 sm:$0xff] }
 0x1db   :  { %2527 = vmatmul.mubr.msk.f32.vlgmr.msra.gmra.mxu1 %vm393_vm10, %v366_v9  ;;  %2567 = vmatprep.subr.mxu1 %v2806_v12  ;;  %v391_v13 = vpop.permute.xlu1 %390 }
 0x1dc   :  { %2529 = vmatprep.mubr.msk.f32.mxu1 %vm393_vm10, %v367_v10 }
 0x1dd   :  { %v386_v14 = vpop.permute.xlu0 %385 }
 0x1df   :  { %2530 = vmatmul.mubr.msk.f32.gmra.mxu1 %vm393_vm10, %v368_v11  ;;  %v381_v15 = vpop.permute.xlu1 %380 }
 0x1e0   :  { %2569 = vmatprep.mubr.msk.f32.mxu1 %vm2808_vm6, %v2806_v12 }
 0x1e1   :  { %v622_v17 = vpop.permute.xlu0 %621 }
 0x1e3   :  { %v376_v21 = vpop.permute.xlu1 %375 }
 0x1e5   :  { %v617_v25 = vpop.permute.xlu0 %616 }
 0x1e7   :  { %v612_v31 = vpop.permute.xlu1 %611 }
 0x1e9   :  { %v607_v38 = vpop.permute.xlu0 %606 }
 0x29b   :  { %v2528_v18 = vpop.f32.mrf.mxu1 }
 0x29c   :  { %v478_v19 = vadd.f32 %v2528_v18, %v381_v15 }
 0x29d   :  { %v472_v22 = vpop.f32.mrf.mxu1 }
 0x29e   :  { %v473_v23 = vadd.f32 %v472_v22, %v376_v21  ;;  %v593_v26 = vadd.f32 %v2536_v16, %v478_v19 }
 0x29f   :  { %v2531_v24 = vpop.f32.mrf.mxu1 }
 0x2a0   :  { %v488_v27 = vadd.f32 %v2531_v24, %v391_v13  ;;  %v592_v32 = vadd.f32 %v573_v20, %v473_v23  ;;  %v625_v34 = vmul.f32 %v612_v31, %v593_v26  ;;  %vm597_vm13 = vcmp.ge.f32.partialorder %v593_v26, 0.0 }
 0x2a1   :  { %v482_v29 = vpop.f32.mrf.mxu1 }
 0x2a2   :  { %v595_v30 = vadd.f32 %v2539_v28, %v488_v27  ;;  %v483_v33 = vadd.f32 %v482_v29, %v386_v14  ;;  %v624_v41 = vmul.f32 %v607_v38, %v592_v32  ;;  %v629_v44 = vsel %vm597_vm13, %v593_v26, %v625_v34  ;;  %v1066_v26 = vld [vmem:[%s2238_s30 + $0x8] sm:$0xff]  ;;  %v1065_v27 = vld [vmem:[%s2238_s30] sm:$0xff]  ;;  %v1067_v28 = vld [vmem:[%s2238_s30 + $0x10] sm:$0xff] }
 0x2a3   :  { %vm596_vm15 = vcmp.ge.f32.partialorder %v592_v32, 0.0  ;;  %v2951_v47 = vmul.f32 %v2871_v40, %v629_v44  ;;  %v753_v29 = vld [vmem:[%s2233_s5] sm:$0x3]  ;;  %s2827_s5 = smov 25  }
 0x2a4   :  { %vm599_vm12 = vcmp.ge.f32.partialorder %v595_v30, 0.0  ;;  %v627_v35 = vmul.f32 %v622_v17, %v595_v30  ;;  %v594_v37 = vadd.f32 %v583_v36, %v483_v33  ;;  %v628_v48 = vsel %vm596_vm15, %v592_v32, %v624_v41  ;;  %s3367_s8 = sld [smem:[%s3453_s0 + %s2827_s5]]  }
 0x2a5   :  { %v2958_v49 = vmul.f32 %v2871_v40, %v628_v48  ;;  %vm1387_vm15 = vcmask 31744  }
 0x2a6   :  { %v631_v39 = vsel %vm599_vm12, %v595_v30, %v627_v35  ;;  %vm598_vm14 = vcmp.ge.f32.partialorder %v594_v37, 0.0  ;;  %v626_v43 = vmul.f32 %v617_v25, %v594_v37  ;;  %v1068_v25 = vld [vmem:[%s2238_s30 + $0x18] sm:$0xff]  ;;  %v673_v30 = vld [vmem:[%s2229_s9] sm:$0x3]  ;;  %s2826_s30 = smov 26  }
 0x2a7   :  { %v2943_v42 = vmul.f32 %v2871_v40, %v631_v39  ;;  %s3349_s4 = sld [smem:[%s3453_s0 + %s2826_s30]]  }
 0x2a8   :  { %v630_v45 = vsel %vm598_vm14, %v594_v37, %v626_v43 }
 0x2a9   :  { %662 = vrot.lane.b32.xlu1 %v2943_v42, %s2797_s11  ;;  %v2948_v46 = vmul.f32 %v2871_v40, %v630_v45 }
 0x2ab   :  { %660 = vrot.lane.b32.xlu0 %v2948_v46, %s2797_s11 }
 0x2ad   :  { %658 = vrot.lane.b32.xlu1 %v2951_v47, %s2797_s11 }
 0x2af   :  { %656 = vrot.lane.b32.xlu0 %v2958_v49, %s2797_s11 }
 0x2b1   :  { %646 = vrot.lane.b32.xlu1 %v2943_v42, %s2795_s3 }
 0x2b3   :  { %644 = vrot.lane.b32.xlu0 %v2948_v46, %s2795_s3 }
 0x2b5   :  { %642 = vrot.lane.b32.xlu1 %v2951_v47, %s2795_s3 }
 0x2b7   :  { %640 = vrot.lane.b32.xlu0 %v2958_v49, %s2795_s3 }
 0x2b9   :  { %984 = vperm.xlu1 %2757, %v966_v50  }
 0x2bb   :  { %959 = vrot.lane.b32.xlu0 %v2304_v51, %s2795_s3 }
 0x2bd   :  { %979 = vperm.xlu1 %2757, %v965_v52  }
 0x2bf   :  { %974 = vperm.xlu0 %2758, %v964_v53  }
 0x2c1   :  { %969 = vperm.xlu1 %2757, %v963_v54  }
 0x31b   :  { %v2984_v55 = vpop.permute.xlu1 %662 }
 0x31c   :  { %2541 = vmatpush3.msk.msra.mxu0 %vm142_vm1, %v2984_v55 }
 0x31d   :  { %2542 = vmatprep.subr.mxu0 %v2806_v12  ;;  %v2989_v56 = vpop.permute.xlu0 %660 }
 0x31e   :  { %2543 = vmatpush3.msk.msra.mxu0 %vm142_vm1, %v2989_v56 }
 0x31f   :  { %v2993_v57 = vpop.permute.xlu1 %658  ;;  %2544 = vmatprep.subr.mxu0 %v2806_v12 }
 0x320   :  { %2545 = vmatpush3.msk.msra.mxu0 %vm142_vm1, %v2993_v57 }
 0x321   :  { %2546 = vmatprep.subr.mxu0 %v2806_v12  ;;  %v2999_v58 = vpop.permute.xlu0 %656 }
 0x322   :  { %2547 = vmatpush3.msk.msra.mxu0 %vm142_vm1, %v2999_v58 }
 0x323   :  { %2548 = vmatprep.subr.mxu0 %v2806_v12  ;;  %v3014_v61 = vpop.permute.xlu1 %646 }
 0x324   :  { %2549 = vmatpush3.msra.mxu0 %v2943_v42 }
 0x325   :  { %2550 = vmatprep.subr.mxu0 %v2806_v12  ;;  %v3006_v59 = vpop.permute.xlu0 %644 }
 0x326   :  { %2551 = vmatpush3.msra.mxu0 %v2948_v46 }
 0x327   :  { %2552 = vmatprep.subr.mxu0 %v2806_v12  ;;  %v3033_v2 = vpop.permute.xlu1 %642 }
 0x328   :  { %2553 = vmatpush3.msra.mxu0 %v2951_v47 }
 0x329   :  { %2554 = vmatprep.subr.mxu0 %v2806_v12  ;;  %v3017_v62 = vpop.permute.xlu0 %640 }
 0x32a   :  { %2555 = vmatpush3.msra.mxu0 %v2958_v49 }
 0x32b   :  { %2556 = vmatprep.subr.mxu0 %v2806_v12 }
 0x32c   :  { %2557 = vmatpush3.msk.msra.mxu0 %vm2914_vm11, %v3014_v61 }
 0x32d   :  { %2558 = vmatprep.subr.mxu0 %v2806_v12  ;;  %v960_v0 = vpop.permute.xlu0 %959 }
 0x32e   :  { %2559 = vmatpush3.msk.msra.mxu0 %vm2914_vm11, %v3006_v59  ;;  %v962_v3 = vsel %vm137_vm2, 0.0, %v960_v0 }
 0x32f   :  { %2560 = vmatprep.subr.mxu0 %v2806_v12  ;;  %v3041_v6 = vrot.slane %v962_v3, %v989_v1 }
 0x330   :  { %2561 = vmatpush3.msk.msra.mxu0 %vm2914_vm11, %v3033_v2 }
 0x331   :  { %2562 = vmatprep.subr.mxu0 %v2806_v12 }
 0x332   :  { %2563 = vmatpush3.msk.msra.mxu0 %vm2914_vm11, %v3017_v62 }
 0x333   :  { %2565 = vmatmul.mubr.msk.f32.vlgmr.msra.gmra.mxu0 %vm393_vm10, %v672_v5 }
 0x334   :  { %v985_v7 = vpop.permute.xlu1 %984 }
 0x335   :  { %v3051_v9 = vmul.f32 %v3041_v6, %v985_v7 }
 0x337   :  { %v1004_v10 = vmul.f32 %v3048_v8, %v3051_v9 }
 0x338   :  { %v980_v11 = vpop.permute.xlu1 %979 }
 0x339   :  { %v3056_v13 = vmul.f32 %v3041_v6, %v980_v11  ;;  %1015 = vadd.xlane.f32.xlu0 %v1004_v10  ;;  %v1008_v15 = vmul.f32 %v1004_v10, %v3051_v9 }
 0x33a   :  { %v975_v14 = vpop.permute.xlu0 %974 }
 0x33b   :  { %v1003_v16 = vmul.f32 %v3048_v8, %v3056_v13  ;;  %v3062_v17 = vmul.f32 %v3041_v6, %v975_v14 }
 0x33c   :  { %v970_v18 = vpop.permute.xlu1 %969 }
 0x33d   :  { %1023 = vadd.xlane.f32.xlu0 %v1008_v15  ;;  %1013 = vadd.xlane.f32.xlu1 %v1003_v16  ;;  %v3065_v19 = vmul.f32 %v3041_v6, %v970_v18  ;;  %v1007_v20 = vmul.f32 %v1003_v16, %v3056_v13  ;;  %v1002_v21 = vmul.f32 %v3048_v8, %v3062_v17 }
 0x33f   :  { %v1001_v22 = vmul.f32 %v3048_v8, %v3065_v19  ;;  %v1006_v23 = vmul.f32 %v1002_v21, %v3062_v17 }
 0x341   :  { %1021 = vadd.xlane.f32.xlu1 %v1007_v20  ;;  %1011 = vadd.xlane.f32.xlu0 %v1002_v21  ;;  %v1005_v24 = vmul.f32 %v1001_v22, %v3065_v19 }
 0x345   :  { %1009 = vadd.xlane.f32.xlu0 %v1001_v22  ;;  %1019 = vadd.xlane.f32.xlu1 %v1006_v23 }
 0x349   :  { %1017 = vadd.xlane.f32.xlu0 %v1005_v24 }
 0x356   :  { %1086 = vperm.xlu1 %2757, %v1068_v25  }
 0x35a   :  { %1076 = vperm.xlu1 %2757, %v1066_v26  }
 0x35e   :  { %1071 = vperm.xlu1 %2757, %v1065_v27  }
 0x35f   :  { %1081 = vperm.xlu0 %2758, %v1067_v28  }
 0x362   :  { %756 = vperm.xlu1 %2757, %v753_v29  }
 0x363   :  { %676 = vperm.xlu0 %2758, %v673_v30  }
 0x3c2   :  { %v1016_v31 = vpop.xlane.xlu0 %1015 }
 0x3c3   :  { %v1028_v32 = vmul.f32 0.018518519, %v1016_v31 }
 0x3c5   :  { %v1036_v35 = vmul.f32 %v1028_v32, %v1028_v32  ;;  %v1048_v20 = vsub.f32 %v3051_v9, %v1028_v32 }
 0x3c6   :  { %v1014_v33 = vpop.xlane.xlu1 %1013  ;;  %v1024_v34 = vpop.xlane.xlu0 %1023 }
 0x3c7   :  { %v1027_v36 = vmul.f32 0.018518519, %v1014_v33  ;;  %v1032_v37 = vmul.f32 0.018518519, %v1024_v34  ;;  %v1121_v34 = vld [vmem:[%s3087_s14] sm:$0xff] }
 0x3c8   :  { %2615 = vmatprep.mubr.msk.f32.mxu0 %vm1153_vm9, %v1121_v34 }
 0x3c9   :  { %v1040_v38 = vsub.f32 %v1032_v37, %v1036_v35  ;;  %v1035_v43 = vmul.f32 %v1027_v36, %v1027_v36  ;;  %v1047_v24 = vsub.f32 %v3056_v13, %v1027_v36 }
 0x3ca   :  { %v1022_v39 = vpop.xlane.xlu1 %1021  ;;  %v1012_v41 = vpop.xlane.xlu0 %1011 }
 0x3cb   :  { %v1044_v44 = vmax.f32 %v1040_v38, 0.0  ;;  %v1031_v45 = vmul.f32 0.018518519, %v1022_v39  ;;  %v1026_v48 = vmul.f32 0.018518519, %v1012_v41 }
 0x3cd   :  { %v1052_v50 = vadd.f32 1e-05, %v1044_v44  ;;  %v1039_v51 = vsub.f32 %v1031_v45, %v1035_v43  ;;  %v1034_v52 = vmul.f32 %v1026_v48, %v1026_v48  ;;  %v1046_v30 = vsub.f32 %v3062_v17, %v1026_v48 }
 0x3ce   :  { %v1020_v53 = vpop.xlane.xlu1 %1019  ;;  %v1010_v54 = vpop.xlane.xlu0 %1009 }
 0x3cf   :  { %2759 = vrsqrt.f32 %v1052_v50  ;;  %v1043_v60 = vmax.f32 %v1039_v51, 0.0  ;;  %v1030_v63 = vmul.f32 0.018518519, %v1020_v53  ;;  %v1025_v0 = vmul.f32 0.018518519, %v1010_v54 }
 0x3d1   :  { %v1051_v1 = vadd.f32 1e-05, %v1043_v60  ;;  %v1038_v3 = vsub.f32 %v1030_v63, %v1034_v52  ;;  %v1033_v10 = vmul.f32 %v1025_v0, %v1025_v0  ;;  %v1045_v37 = vsub.f32 %v3065_v19, %v1025_v0 }
 0x3d2   :  { %v1018_v5 = vpop.xlane.xlu0 %1017  ;;  %v1087_v23 = vpop.permute.xlu1 %1086 }
 0x3d3   :  { %2761 = vrsqrt.f32 %v1051_v1  ;;  %v1042_v7 = vmax.f32 %v1038_v3, 0.0  ;;  %v1029_v11 = vmul.f32 0.018518519, %v1018_v5  ;;  %v1127_v1 = vld [vmem:[%s2237_s19 + $0x10] sm:$0xff]  ;;  %v1128_v3 = vld [vmem:[%s2237_s19 + $0x18] sm:$0xff]  ;;  %v1125_v5 = vld [vmem:[%s2237_s19] sm:$0xff] }
 0x3d5   :  { %v1050_v14 = vadd.f32 1e-05, %v1042_v7  ;;  %v1037_v15 = vsub.f32 %v1029_v11, %v1033_v10  ;;  %v1126_v7 = vld [vmem:[%s2237_s19 + $0x8] sm:$0xff]  ;;  %v937_v10 = vld [vmem:[%s2234_s23] sm:$0x3] }
 0x3d6   :  { %v1077_v33 = vpop.permute.xlu1 %1076  ;;  %v779_v11 = vld [vmem:[%s2231_s28] sm:$0x3] }
 0x3d7   :  { %2763 = vrsqrt.f32 %v1050_v14  ;;  %v1041_v16 = vmax.f32 %v1037_v15, 0.0 }
 0x3d9   :  { %v1049_v18 = vadd.f32 1e-05, %v1041_v16 }
 0x3da   :  { %v1082_v29 = vpop.permute.xlu0 %1081  ;;  %v1072_v43 = vpop.permute.xlu1 %1071 }
 0x3db   :  { %2765 = vrsqrt.f32 %v1049_v18 }
 0x3dc   :  { %v2760_v21 = vpop.eup %2759 }
 0x3dd   :  { %v1060_v22 = vmul.f32 %v2760_v21, %v1048_v20  ;;  %v1122_v20 = vld [vmem:[%s3087_s14 + $0x8] sm:$0xff]  ;;  %v1123_v21 = vld [vmem:[%s3087_s14 + $0x10] sm:$0xff] }
 0x3de   :  { %v677_v50 = vpop.permute.xlu0 %676  ;;  %v757_v53 = vpop.permute.xlu1 %756 }
 0x3df   :  { %v1092_v25 = vmul.f32 %v1087_v23, %v1060_v22  ;;  %vm1064_vm7 = vcmp.ge.f32.partialorder %v1060_v22, 0.0 }
 0x3e0   :  { %v2762_v26 = vpop.eup %2761 }
 0x3e1   :  { %v1059_v27 = vmul.f32 %v2762_v26, %v1047_v24  ;;  %v1096_v28 = vsel %vm1064_vm7, %v1060_v22, %v1092_v25  ;;  %v1124_v22 = vld [vmem:[%s3087_s14 + $0x18] sm:$0xff] }
 0x3e2   :  { %v1100_v9 = vmul.f32 %v3048_v8, %v1096_v28 }
 0x3e3   :  { %v1091_v31 = vmul.f32 %v1082_v29, %v1059_v27  ;;  %vm1063_vm8 = vcmp.ge.f32.partialorder %v1059_v27, 0.0 }
 0x3e4   :  { %v2764_v32 = vpop.eup %2763  ;;  %1111 = vrot.lane.b32.xlu0 %v1100_v9, %s2795_s3  ;;  %2599 = vmatprep.subr.mxu0 %v1100_v9 }
 0x3e5   :  { %v1058_v13 = vmul.f32 %v2764_v32, %v1046_v30  ;;  %2600 = vmatpush3.msra.mxu0 %v1100_v9  ;;  %v1095_v35 = vsel %vm1063_vm8, %v1059_v27, %v1091_v31  ;;  %vm950_vm8 = vcmask 236544  }
 0x3e6   :  { %v1099_v36 = vmul.f32 %v3048_v8, %v1095_v35 }
 0x3e7   :  { %v1090_v38 = vmul.f32 %v1077_v33, %v1058_v13  ;;  %vm1062_vm12 = vcmp.ge.f32.partialorder %v1058_v13, 0.0 }
 0x3e8   :  { %v2766_v17 = vpop.eup %2765  ;;  %1109 = vrot.lane.b32.xlu1 %v1099_v36, %s2795_s3  ;;  %2601 = vmatprep.subr.mxu0 %v1099_v36 }
 0x3e9   :  { %v1057_v39 = vmul.f32 %v2766_v17, %v1045_v37  ;;  %2602 = vmatpush3.msra.mxu0 %v1099_v36  ;;  %v1094_v41 = vsel %vm1062_vm12, %v1058_v13, %v1090_v38 }
 0x3ea   :  { %v1098_v44 = vmul.f32 %v3048_v8, %v1094_v41 }
 0x3eb   :  { %v1089_v45 = vmul.f32 %v1072_v43, %v1057_v39  ;;  %vm1061_vm13 = vcmp.ge.f32.partialorder %v1057_v39, 0.0 }
 0x3ec   :  { %1107 = vrot.lane.b32.xlu0 %v1098_v44, %s2795_s3  ;;  %2603 = vmatprep.subr.mxu0 %v1098_v44 }
 0x3ed   :  { %2604 = vmatpush3.msra.mxu0 %v1098_v44  ;;  %v1093_v48 = vsel %vm1061_vm13, %v1057_v39, %v1089_v45  ;;  %v1318_v44 = vld [vmem:[%s2239_s10 + $0x18] sm:$0xff]  ;;  %v1316_v45 = vld [vmem:[%s2239_s10 + $0x8] sm:$0xff] }
 0x3ee   :  { %v1097_v19 = vmul.f32 %v3048_v8, %v1093_v48 }
 0x3f0   :  { %1105 = vrot.lane.b32.xlu1 %v1097_v19, %s2795_s3  ;;  %2605 = vmatprep.subr.mxu0 %v1097_v19 }
 0x3f1   :  { %2606 = vmatpush3.msra.mxu0 %v1097_v19 }
 0x3f3   :  { %v748_v51 = vpop.f32.mrf.mxu0 }
 0x3f4   :  { %v749_v52 = vadd.f32 %v748_v51, %v677_v50 }
 0x3f5   :  { %v2566_v54 = vpop.f32.mrf.mxu0 }
 0x3f6   :  { %vm752_vm14 = vcmp.ge.f32.partialorder %v749_v52, 0.0  ;;  %v759_v60 = vmul.f32 %v757_v53, %v749_v52 }
 0x3f8   :  { %v760_v63 = vsel %vm752_vm14, %v749_v52, %v759_v60  ;;  %v1317_v52 = vld [vmem:[%s2239_s10 + $0x10] sm:$0xff] }
 0x3f9   :  { %v761_v0 = vmul.f32 %v2871_v40, %v760_v63 }
 0x3fb   :  { %763 = vrot.lane.b32.xlu1 %v761_v0, %s2795_s3  ;;  %767 = vrot.lane.b32.xlu0 %v761_v0, %s2797_s11  ;;  %s2818_s11 = smov 13   ;;  %v771_v24 = vrot.slane %v761_v0, 6 }
 0x3fc   :  { %s2230_s1 = sld [smem:[%s3453_s0 + %s2818_s11]]  }
 0x3ff   :  { %1141 = vperm.xlu1 %2757, %v1127_v1   ;;  %1146 = vperm.xlu0 %2758, %v1128_v3   ;;  %v1315_v3 = vld [vmem:[%s2239_s10] sm:$0xff]  ;;  %s2246_s10 = sld [smem:[%s3453_s0 + %s2821_s12]]  }
 0x402   :  { %v778_v9 = vld [vmem:[%s2230_s1] sm:$0x3] }
 0x403   :  { %1131 = vperm.xlu1 %2757, %v1125_v5   ;;  %1136 = vperm.xlu0 %2758, %v1126_v7  }
 0x407   :  { %940 = vperm.xlu1 %2757, %v937_v10   ;;  %782 = vperm.xlu0 %2758, %v779_v11  }
 0x456   :  { %v1112_v14 = vpop.permute.xlu0 %1111 }
 0x457   :  { %2607 = vmatprep.subr.msk.mxu0 %vm2914_vm11, %v1112_v14 }
 0x458   :  { %2608 = vmatpush3.msk.msra.mxu0 %vm2914_vm11, %v1112_v14 }
 0x45a   :  { %v1110_v15 = vpop.permute.xlu1 %1109 }
 0x45b   :  { %2609 = vmatprep.subr.msk.mxu0 %vm2914_vm11, %v1110_v15 }
 0x45c   :  { %2610 = vmatpush3.msk.msra.mxu0 %vm2914_vm11, %v1110_v15 }
 0x45e   :  { %v1108_v16 = vpop.permute.xlu0 %1107 }
 0x45f   :  { %2611 = vmatprep.subr.msk.mxu0 %vm2914_vm11, %v1108_v16 }
 0x460   :  { %2612 = vmatpush3.msk.msra.mxu0 %vm2914_vm11, %v1108_v16 }
 0x462   :  { %v1106_v18 = vpop.permute.xlu1 %1105 }
 0x463   :  { %2613 = vmatprep.subr.msk.mxu0 %vm2914_vm11, %v1106_v18 }
 0x464   :  { %2614 = vmatpush3.msk.msra.mxu0 %vm2914_vm11, %v1106_v18 }
 0x465   :  { %2616 = vmatmul.mubr.msk.f32.vlgmr.msra.gmra.mxu0 %vm1153_vm9, %v1122_v20 }
 0x466   :  { %2618 = vmatprep.mubr.msk.f32.mxu0 %vm1153_vm9, %v1123_v21 }
 0x469   :  { %2619 = vmatmul.mubr.msk.f32.gmra.mxu0 %vm1153_vm9, %v1124_v22 }
 0x46d   :  { %v764_v23 = vpop.permute.xlu1 %763  ;;  %v768_v25 = vpop.permute.xlu0 %767 }
 0x46e   :  { %v766_v26 = vsel %vm137_vm2, 0.0, %v764_v23  ;;  %v770_v27 = vsel %vm142_vm1, %v768_v25, 0.0 }
 0x46f   :  { %v776_v28 = vsel %vm149_vm3, %v766_v26, %v771_v24  ;;  %v774_v29 = vrot.slane %v770_v27, 4 }
 0x471   :  { %v777_v30 = vsel %vm151_vm4, %v776_v28, %v774_v29 }
 0x472   :  { %2568 = vmatpush3.msk.msra.mxu1 %vm194_vm5, %v777_v30 }
 0x473   :  { %2570 = vmatmul.mubr.msk.f32.vlgmr.msra.gmra.mxu1 %vm181_vm0, %v778_v9  ;;  %2572 = vmatprep.subr.mxu1 %v2806_v12 }
 0x474   :  { %2573 = vmatpush3.msk.msra.mxu1 %vm142_vm1, %v2984_v55  ;;  %2596 = vmatprep.mubr.msk.f32.mxu1 %vm2808_vm6, %v2806_v12 }
 0x475   :  { %2574 = vmatprep.subr.mxu1 %v2806_v12 }
 0x476   :  { %2575 = vmatpush3.msk.msra.mxu1 %vm142_vm1, %v2989_v56 }
 0x477   :  { %2576 = vmatprep.subr.mxu1 %v2806_v12 }
 0x478   :  { %2577 = vmatpush3.msk.msra.mxu1 %vm142_vm1, %v2993_v57 }
 0x479   :  { %2578 = vmatprep.subr.mxu1 %v2806_v12 }
 0x47a   :  { %2579 = vmatpush3.msk.msra.mxu1 %vm142_vm1, %v2999_v58 }
 0x47b   :  { %2580 = vmatprep.subr.mxu1 %v2806_v12 }
 0x47c   :  { %2581 = vmatpush3.msra.mxu1 %v2943_v42  ;;  %v861_v42 = vld [vmem:[%s2232_s6] sm:$0x3] }
 0x47d   :  { %2582 = vmatprep.subr.mxu1 %v2806_v12 }
 0x47e   :  { %2583 = vmatpush3.msra.mxu1 %v2948_v46  ;;  %v1147_v46 = vpop.permute.xlu0 %1146 }
 0x47f   :  { %2584 = vmatprep.subr.mxu1 %v2806_v12  ;;  %v1152_v33 = vmul.f32 %v1147_v46, %v3041_v6 }
 0x480   :  { %2585 = vmatpush3.msra.mxu1 %v2951_v47  ;;  %v1142_v47 = vpop.permute.xlu1 %1141 }
 0x481   :  { %2586 = vmatprep.subr.mxu1 %v2806_v12  ;;  %v1151_v32 = vmul.f32 %v1142_v47, %v3041_v6 }
 0x482   :  { %2587 = vmatpush3.msra.mxu1 %v2958_v49  ;;  %v1137_v49 = vpop.permute.xlu0 %1136 }
 0x483   :  { %2588 = vmatprep.subr.mxu1 %v2806_v12  ;;  %v1150_v56 = vmul.f32 %v1137_v49, %v3041_v6 }
 0x484   :  { %2589 = vmatpush3.msk.msra.mxu1 %vm2914_vm11, %v3014_v61  ;;  %v1132_v55 = vpop.permute.xlu1 %1131 }
 0x485   :  { %2590 = vmatprep.subr.mxu1 %v2806_v12  ;;  %v1149_v58 = vmul.f32 %v1132_v55, %v3041_v6 }
 0x486   :  { %2591 = vmatpush3.msk.msra.mxu1 %vm2914_vm11, %v3006_v59  ;;  %v783_v48 = vpop.permute.xlu0 %782 }
 0x487   :  { %2592 = vmatprep.subr.mxu1 %v2806_v12 }
 0x488   :  { %2593 = vmatpush3.msk.msra.mxu1 %vm2914_vm11, %v3033_v2  ;;  %v941_v53 = vpop.permute.xlu1 %940 }
 0x489   :  { %2594 = vmatprep.subr.mxu1 %v2806_v12 }
 0x48a   :  { %2595 = vmatpush3.msk.msra.mxu1 %vm2914_vm11, %v3017_v62 }
 0x48b   :  { %2597 = vmatmul.mubr.msk.f32.vlgmr.msra.gmra.mxu1 %vm393_vm10, %v861_v42 }
 0x525   :  { %v2617_v57 = vpop.f32.mrf.mxu0 }
 0x526   :  { %v3189_v59 = vadd.f32 %v2617_v57, %v1150_v56 }
 0x527   :  { %v1232_v61 = vpop.f32.mrf.mxu0 }
 0x528   :  { %v3191_v2 = vadd.f32 %v1232_v61, %v1149_v58  ;;  %v1252_v31 = vmul.f32 %v3048_v8, %v3189_v59 }
 0x529   :  { %v2620_v62 = vpop.f32.mrf.mxu0 }
 0x52a   :  { %1261 = vadd.xlane.f32.xlu0 %v1252_v31  ;;  %v1256_v34 = vmul.f32 %v1252_v31, %v3189_v59  ;;  %v3198_v35 = vadd.f32 %v2620_v62, %v1152_v33  ;;  %v1251_v37 = vmul.f32 %v3048_v8, %v3191_v2 }
 0x52b   :  { %v1242_v13 = vpop.f32.mrf.mxu0 }
 0x52c   :  { %v3200_v36 = vadd.f32 %v1242_v13, %v1151_v32  ;;  %1269 = vadd.xlane.f32.xlu1 %v1256_v34  ;;  %v1254_v6 = vmul.f32 %v3048_v8, %v3198_v35  ;;  %v1255_v43 = vmul.f32 %v1251_v37, %v3191_v2 }
 0x52e   :  { %1259 = vadd.xlane.f32.xlu0 %v1251_v37  ;;  %v1253_v38 = vmul.f32 %v3048_v8, %v3200_v36  ;;  %v1258_v39 = vmul.f32 %v1254_v6, %v3198_v35 }
 0x530   :  { %1263 = vadd.xlane.f32.xlu1 %v1253_v38  ;;  %v1257_v1 = vmul.f32 %v1253_v38, %v3200_v36 }
 0x532   :  { %1265 = vadd.xlane.f32.xlu0 %v1254_v6 }
 0x533   :  { %v857_v17 = vpop.f32.mrf.mxu1 }
 0x534   :  { %v858_v19 = vadd.f32 %v857_v17, %v783_v48 }
 0x535   :  { %v2571_v41 = vpop.f32.mrf.mxu1 }
 0x536   :  { %1273 = vadd.xlane.f32.xlu0 %v1258_v39 }
 0x53a   :  { %1267 = vadd.xlane.f32.xlu0 %v1255_v43 }
 0x541   :  { %1336 = vperm.xlu1 %2757, %v1318_v44  }
 0x545   :  { %1326 = vperm.xlu1 %2757, %v1316_v45  }
 0x54b   :  { %v931_v50 = vpop.f32.mrf.mxu1 }
 0x54c   :  { %v935_v51 = vadd.f32 %v931_v50, %v858_v19 }
 0x54d   :  { %v2598_v54 = vpop.f32.mrf.mxu1 }
 0x54e   :  { %vm936_vm0 = vcmp.ge.f32.partialorder %v935_v51, 0.0  ;;  %v943_v60 = vmul.f32 %v941_v53, %v935_v51 }
 0x550   :  { %1331 = vperm.xlu0 %2758, %v1317_v52   ;;  %v944_v63 = vsel %vm936_vm0, %v935_v51, %v943_v60 }
 0x551   :  { %v3214_v0 = vmul.f32 %v2871_v40, %v944_v63  ;;  %v1379_v63 = vld [vmem:[%s3242_s16] sm:$0xff] }
 0x552   :  { %2645 = vmatprep.mubr.msk.f32.mxu1 %vm1153_vm9, %v1379_v63 }
 0x554   :  { %947 = vrot.lane.b32.xlu0 %v3214_v0, %s2821_s12  ;;  %s2828_s12 = smov 30  }
 0x555   :  { %s2247_s15 = sld [smem:[%s3453_s0 + %s2828_s12]]  }
 0x569   :  { %1271 = vadd.xlane.f32.xlu1 %v1257_v1 }
 0x57a   :  { %1321 = vperm.xlu1 %2757, %v1315_v3   ;;  %v1383_v3 = vld [vmem:[%s3247_s21] sm:$0xff] }
 0x57b   :  { %2623 = vmatprep.mubr.msk.f32.mxu0 %vm1387_vm15, %v1383_v3 }
 0x5b3   :  { %v1262_v5 = vpop.xlane.xlu0 %1261 }
 0x5b4   :  { %v1276_v7 = vmul.f32 0.018518519, %v1262_v5 }
 0x5b5   :  { %v1270_v10 = vpop.xlane.xlu1 %1269 }
 0x5b6   :  { %v1284_v11 = vmul.f32 %v1276_v7, %v1276_v7  ;;  %v1280_v14 = vmul.f32 0.018518519, %v1270_v10  ;;  %v1296_v42 = vsub.f32 %v3189_v59, %v1276_v7 }
 0x5b7   :  { %v1260_v15 = vpop.xlane.xlu0 %1259 }
 0x5b8   :  { %v1288_v16 = vsub.f32 %v1280_v14, %v1284_v11  ;;  %v1275_v46 = vmul.f32 0.018518519, %v1260_v15 }
 0x5b9   :  { %v1264_v28 = vpop.xlane.xlu1 %1263 }
 0x5ba   :  { %v1292_v20 = vmax.f32 %v1288_v16, 0.0  ;;  %v1283_v57 = vmul.f32 %v1275_v46, %v1275_v46  ;;  %v1277_v38 = vmul.f32 0.018518519, %v1264_v28  ;;  %v1295_v17 = vsub.f32 %v3191_v2, %v1275_v46  ;;  %v1386_v28 = vld [vmem:[%s3247_s21 + $0x18] sm:$0xff] }
 0x5bb   :  { %v1266_v18 = vpop.xlane.xlu0 %1265 }
 0x5bc   :  { %v1278_v40 = vmul.f32 0.018518519, %v1266_v18  ;;  %v1300_v22 = vadd.f32 1e-05, %v1292_v20  ;;  %v1285_v41 = vmul.f32 %v1277_v38, %v1277_v38  ;;  %v1297_v54 = vsub.f32 %v3200_v36, %v1277_v38  ;;  %v1652_v38 = vld [vmem:[%s2245_s29 + $0x18] sm:$0xff] }
 0x5bd   :  { %v1337_v9 = vpop.permute.xlu1 %1336 }
 0x5be   :  { %v1286_v23 = vmul.f32 %v1278_v40, %v1278_v40  ;;  %2767 = vrsqrt.f32 %v1300_v22  ;;  %v1298_v47 = vsub.f32 %v3198_v35, %v1278_v40 }
 0x5bf   :  { %v1274_v21 = vpop.xlane.xlu0 %1273 }
 0x5c0   :  { %v1282_v24 = vmul.f32 0.018518519, %v1274_v21  ;;  %v1380_v21 = vld [vmem:[%s3242_s16 + $0x8] sm:$0xff] }
 0x5c1   :  { %v1327_v61 = vpop.permute.xlu1 %1326 }
 0x5c2   :  { %v1290_v25 = vsub.f32 %v1282_v24, %v1286_v23  ;;  %v1381_v23 = vld [vmem:[%s3242_s16 + $0x10] sm:$0xff] }
 0x5c3   :  { %v1268_v30 = vpop.xlane.xlu0 %1267 }
 0x5c4   :  { %v1294_v26 = vmax.f32 %v1290_v25, 0.0  ;;  %v1279_v55 = vmul.f32 0.018518519, %v1268_v30  ;;  %v1384_v25 = vld [vmem:[%s3247_s21 + $0x8] sm:$0xff] }
 0x5c6   :  { %v1302_v27 = vadd.f32 1e-05, %v1294_v26  ;;  %v1287_v62 = vsub.f32 %v1279_v55, %v1283_v57  ;;  %v1385_v26 = vld [vmem:[%s3247_s21 + $0x10] sm:$0xff] }
 0x5c8   :  { %2769 = vrsqrt.f32 %v1302_v27  ;;  %v1291_v59 = vmax.f32 %v1287_v62, 0.0  ;;  %v1382_v27 = vld [vmem:[%s3242_s16 + $0x18] sm:$0xff] }
 0x5ca   :  { %v1299_v37 = vadd.f32 1e-05, %v1291_v59 }
 0x5cb   :  { %v2768_v29 = vpop.eup %2767  ;;  %v1332_v2 = vpop.permute.xlu0 %1331 }
 0x5cc   :  { %v1308_v49 = vmul.f32 %v2768_v29, %v1296_v42  ;;  %2771 = vrsqrt.f32 %v1299_v37  ;;  %v1689_v29 = vld [vmem:[%s3275_s25] sm:$0xff] }
 0x5ce   :  { %v1340_v31 = vmul.f32 %v1327_v61, %v1308_v49  ;;  %vm1312_vm5 = vcmp.ge.f32.partialorder %v1308_v49, 0.0 }
 0x5cf   :  { %v948_v7 = vpop.permute.xlu0 %947 }
 0x5d0   :  { %v1344_v13 = vsel %vm1312_vm5, %v1308_v49, %v1340_v31  ;;  %v951_v14 = vsel %vm950_vm8, 0.0, %v948_v7 }
 0x5d1   :  { %v3229_v35 = vmul.f32 %v3048_v8, %v1344_v13  ;;  %v952_v36 = vadd.f32 %v951_v14, %v3214_v0 }
 0x5d3   :  { %v1376_v18 = vrot.slane %v952_v36, 6 }
 0x5d5   :  { %v2770_v56 = vpop.eup %2769 }
 0x5d6   :  { %v1310_v58 = vmul.f32 %v2770_v56, %v1298_v47 }
 0x5d8   :  { %vm1314_vm1 = vcmp.ge.f32.partialorder %v1310_v58, 0.0  ;;  %v1342_v32 = vmul.f32 %v1337_v9, %v1310_v58  ;;  %v1690_v9 = vld [vmem:[%s3275_s25 + $0x8] sm:$0xff] }
 0x5d9   :  { %v2772_v6 = vpop.eup %2771 }
 0x5da   :  { %v1346_v33 = vsel %vm1314_vm1, %v1310_v58, %v1342_v32  ;;  %v1307_v44 = vmul.f32 %v2772_v6, %v1295_v17  ;;  %v1650_v6 = vld [vmem:[%s2245_s29 + $0x8] sm:$0xff]  ;;  %v1651_v17 = vld [vmem:[%s2245_s29 + $0x10] sm:$0xff] }
 0x5db   :  { %v3222_v34 = vmul.f32 %v3048_v8, %v1346_v33 }
 0x5dc   :  { %vm1311_vm10 = vcmp.ge.f32.partialorder %v1307_v44, 0.0 }
 0x5dd   :  { %1361 = vrot.lane.b32.xlu1 %v3222_v34, %s2795_s3  ;;  %2629 = vmatprep.subr.mxu1 %v3222_v34 }
 0x5de   :  { %2630 = vmatpush3.msra.mxu1 %v3222_v34 }
 0x5e1   :  { %1357 = vrot.lane.b32.xlu1 %v3229_v35, %s2795_s3 }
 0x5f2   :  { %v1272_v39 = vpop.xlane.xlu1 %1271 }
 0x5f3   :  { %v1281_v43 = vmul.f32 0.018518519, %v1272_v39 }
 0x5f5   :  { %v1289_v45 = vsub.f32 %v1281_v43, %v1285_v41  ;;  %v1649_v41 = vld [vmem:[%s2245_s29] sm:$0xff] }
 0x5f6   :  { %v1322_v48 = vpop.permute.xlu1 %1321 }
 0x5f7   :  { %v1293_v19 = vmax.f32 %v1289_v45, 0.0  ;;  %v1339_v50 = vmul.f32 %v1322_v48, %v1307_v44 }
 0x5f9   :  { %v1301_v51 = vadd.f32 1e-05, %v1293_v19  ;;  %v1343_v52 = vsel %vm1311_vm10, %v1307_v44, %v1339_v50 }
 0x5fa   :  { %v3235_v53 = vmul.f32 %v3048_v8, %v1343_v52 }
 0x5fb   :  { %2773 = vrsqrt.f32 %v1301_v51 }
 0x5fc   :  { %1355 = vrot.lane.b32.xlu1 %v3235_v53, %s2795_s3 }
 0x608   :  { %v2774_v60 = vpop.eup %2773 }
 0x609   :  { %v1309_v1 = vmul.f32 %v2774_v60, %v1297_v54 }
 0x60b   :  { %vm1313_vm7 = vcmp.ge.f32.partialorder %v1309_v1, 0.0  ;;  %v1341_v5 = vmul.f32 %v1332_v2, %v1309_v1 }
 0x60d   :  { %v1345_v10 = vsel %vm1313_vm7, %v1309_v1, %v1341_v5 }
 0x60e   :  { %v1349_v11 = vmul.f32 %v3048_v8, %v1345_v10 }
 0x610   :  { %1359 = vrot.lane.b32.xlu0 %v1349_v11, %s2795_s3  ;;  %2631 = vmatprep.subr.mxu1 %v1349_v11 }
 0x611   :  { %2632 = vmatpush3.msra.mxu1 %v1349_v11 }
 0x612   :  { %2633 = vmatprep.subr.mxu1 %v3229_v35 }
 0x613   :  { %2634 = vmatpush3.msra.mxu1 %v3229_v35 }
 0x614   :  { %2635 = vmatprep.subr.mxu1 %v3235_v53  ;;  %1372 = vrot.lane.b32.xlu0 %v952_v36, %s2795_s3 }
 0x615   :  { %2636 = vmatpush3.msra.mxu1 %v3235_v53 }
 0x64f   :  { %v1362_v15 = vpop.permute.xlu1 %1361 }
 0x650   :  { %2637 = vmatprep.subr.msk.mxu1 %vm2914_vm11, %v1362_v15 }
 0x651   :  { %2638 = vmatpush3.msk.msra.mxu1 %vm2914_vm11, %v1362_v15 }
 0x653   :  { %v1358_v0 = vpop.permute.xlu1 %1357 }
 0x66e   :  { %v1356_v20 = vpop.permute.xlu1 %1355 }
 0x682   :  { %v1360_v16 = vpop.permute.xlu0 %1359 }
 0x683   :  { %2639 = vmatprep.subr.msk.mxu1 %vm2914_vm11, %v1360_v16 }
 0x684   :  { %2640 = vmatpush3.msk.msra.mxu1 %vm2914_vm11, %v1360_v16 }
 0x685   :  { %2641 = vmatprep.subr.msk.mxu1 %vm2914_vm11, %v1358_v0 }
 0x686   :  { %2642 = vmatpush3.msk.msra.mxu1 %vm2914_vm11, %v1358_v0  ;;  %v1373_v40 = vpop.permute.xlu0 %1372 }
 0x687   :  { %v1375_v22 = vsel %vm137_vm2, 0.0, %v1373_v40  ;;  %2643 = vmatprep.subr.msk.mxu1 %vm2914_vm11, %v1356_v20 }
 0x688   :  { %v1378_v24 = vsel %vm149_vm3, %v1375_v22, %v1376_v18  ;;  %2644 = vmatpush3.msk.msra.mxu1 %vm2914_vm11, %v1356_v20 }
 0x689   :  { %2621 = vmatprep.subr.msk.mxu0 %vm151_vm4, %v1378_v24  ;;  %2646 = vmatmul.mubr.msk.f32.vlgmr.msra.gmra.mxu1 %vm1153_vm9, %v1380_v21 }
 0x68a   :  { %2622 = vmatpush3.msk.msra.mxu0 %vm151_vm4, %v1378_v24  ;;  %2648 = vmatprep.mubr.msk.f32.mxu1 %vm1153_vm9, %v1381_v23 }
 0x68b   :  { %2624 = vmatmul.mubr.msk.f32.vlgmr.msra.gmra.mxu0 %vm1387_vm15, %v1384_v25  ;;  %2651 = vmatprep.subr.msk.mxu0 %vm151_vm4, %v1378_v24  ;;  %v1685_v25 = vld [vmem:[%s3349_s4] sm:$0xff] }
 0x68c   :  { %2652 = vmatpush3.msk.msra.mxu0 %vm151_vm4, %v1378_v24  ;;  %2626 = vmatprep.mubr.msk.f32.mxu0 %vm1387_vm15, %v1385_v26  ;;  %v1686_v26 = vld [vmem:[%s3349_s4 + $0x8] sm:$0xff] }
 0x68d   :  { %2659 = vmatprep.subr.mxu0 %v3222_v34  ;;  %2649 = vmatmul.mubr.msk.f32.gmra.mxu1 %vm1153_vm9, %v1382_v27 }
 0x68f   :  { %2627 = vmatmul.mubr.msk.f32.gmra.mxu0 %vm1387_vm15, %v1386_v28 }
 0x690   :  { %2653 = vmatprep.mubr.msk.f32.mxu0 %vm1387_vm15, %v1689_v29 }
 0x693   :  { %2654 = vmatmul.mubr.msk.f32.vlgmr.msra.gmra.mxu0 %vm1387_vm15, %v1690_v9 }
 0x694   :  { %2660 = vmatpush3.msra.mxu0 %v3222_v34 }
 0x695   :  { %2661 = vmatprep.subr.mxu0 %v1349_v11 }
 0x696   :  { %2662 = vmatpush3.msra.mxu0 %v1349_v11 }
 0x697   :  { %2663 = vmatprep.subr.mxu0 %v3229_v35 }
 0x698   :  { %2664 = vmatpush3.msra.mxu0 %v3229_v35 }
 0x699   :  { %2665 = vmatprep.subr.mxu0 %v3235_v53 }
 0x69a   :  { %2666 = vmatpush3.msra.mxu0 %v3235_v53 }
 0x69b   :  { %2667 = vmatprep.subr.msk.mxu0 %vm2914_vm11, %v1362_v15 }
 0x69c   :  { %2668 = vmatpush3.msk.msra.mxu0 %vm2914_vm11, %v1362_v15  ;;  %v1691_v15 = vld [vmem:[%s3275_s25 + $0x10] sm:$0xff] }
 0x69d   :  { %2669 = vmatprep.subr.msk.mxu0 %vm2914_vm11, %v1360_v16  ;;  %2656 = vmatprep.mubr.msk.f32.mxu0 %vm1387_vm15, %v1691_v15 }
 0x69e   :  { %2670 = vmatpush3.msk.msra.mxu0 %vm2914_vm11, %v1360_v16 }
 0x69f   :  { %2671 = vmatprep.subr.msk.mxu0 %vm2914_vm11, %v1358_v0 }
 0x6a0   :  { %2672 = vmatpush3.msk.msra.mxu0 %vm2914_vm11, %v1358_v0  ;;  %v1692_v0 = vld [vmem:[%s3275_s25 + $0x18] sm:$0xff] }
 0x6a1   :  { %2673 = vmatprep.subr.msk.mxu0 %vm2914_vm11, %v1356_v20  ;;  %2657 = vmatmul.mubr.msk.f32.gmra.mxu0 %vm1387_vm15, %v1692_v0 }
 0x6a2   :  { %2674 = vmatpush3.msk.msra.mxu0 %vm2914_vm11, %v1356_v20  ;;  %2675 = vmatprep.mubr.msk.f32.mxu0 %vm1153_vm9, %v1685_v25 }
 0x6a3   :  { %2703 = vmatprep.subr.mxu0 %v2806_v12 }
 0x6a5   :  { %2676 = vmatmul.mubr.msk.f32.vlgmr.msra.gmra.mxu0 %vm1153_vm9, %v1686_v26 }
 0x749   :  { %v2647_v30 = vpop.f32.mrf.mxu1 }
 0x74b   :  { %v2625_v42 = vpop.f32.mrf.mxu0  ;;  %v1566_v46 = vpop.f32.mrf.mxu1 }
 0x74c   :  { %v1572_v47 = vadd.f32 %v2647_v30, %v2625_v42 }
 0x74d   :  { %v1469_v49 = vpop.f32.mrf.mxu0  ;;  %v2650_v55 = vpop.f32.mrf.mxu1 }
 0x74e   :  { %v3328_v56 = vadd.f32 %v1566_v46, %v1469_v49  ;;  %v1586_v57 = vmul.f32 %v3048_v8, %v1572_v47 }
 0x74f   :  { %v2628_v58 = vpop.f32.mrf.mxu0  ;;  %v1576_v62 = vpop.f32.mrf.mxu1 }
 0x750   :  { %1595 = vadd.xlane.f32.xlu0 %v1586_v57  ;;  %v1590_v61 = vmul.f32 %v1586_v57, %v1572_v47  ;;  %v1582_v32 = vadd.f32 %v2650_v55, %v2628_v58  ;;  %v1585_v34 = vmul.f32 %v3048_v8, %v3328_v56 }
 0x751   :  { %v1479_v31 = vpop.f32.mrf.mxu0 }
 0x752   :  { %v3331_v33 = vadd.f32 %v1576_v62, %v1479_v31  ;;  %1603 = vadd.xlane.f32.xlu1 %v1590_v61  ;;  %v1588_v59 = vmul.f32 %v3048_v8, %v1582_v32  ;;  %v1589_v37 = vmul.f32 %v1585_v34, %v3328_v56 }
 0x754   :  { %1593 = vadd.xlane.f32.xlu0 %v1585_v34  ;;  %v1587_v13 = vmul.f32 %v3048_v8, %v3331_v33  ;;  %v1592_v35 = vmul.f32 %v1588_v59, %v1582_v32 }
 0x756   :  { %1597 = vadd.xlane.f32.xlu1 %v1587_v13  ;;  %v1591_v39 = vmul.f32 %v1587_v13, %v3331_v33  ;;  %v1688_v13 = vld [vmem:[%s3349_s4 + $0x18] sm:$0xff] }
 0x758   :  { %1599 = vadd.xlane.f32.xlu0 %v1588_v59 }
 0x75c   :  { %1607 = vadd.xlane.f32.xlu0 %v1592_v35 }
 0x760   :  { %1601 = vadd.xlane.f32.xlu0 %v1589_v37 }
 0x767   :  { %1670 = vperm.xlu1 %2757, %v1652_v38  }
 0x76b   :  { %1660 = vperm.xlu1 %2757, %v1650_v6  }
 0x776   :  { %1665 = vperm.xlu0 %2758, %v1651_v17   ;;  %v1907_v17 = vld [vmem:[%s3367_s8] sm:$0xff] }
 0x777   :  { %2697 = vmatprep.mubr.msk.f32.mxu1 %vm1153_vm9, %v1907_v17 }
 0x78f   :  { %1605 = vadd.xlane.f32.xlu1 %v1591_v39 }
 0x7a0   :  { %1655 = vperm.xlu1 %2757, %v1649_v41  }
 0x7d9   :  { %v1596_v43 = vpop.xlane.xlu0 %1595 }
 0x7da   :  { %v1610_v44 = vmul.f32 0.018518519, %v1596_v43 }
 0x7db   :  { %v1604_v45 = vpop.xlane.xlu1 %1603 }
 0x7dc   :  { %v1618_v48 = vmul.f32 %v1610_v44, %v1610_v44  ;;  %v1614_v19 = vmul.f32 0.018518519, %v1604_v45  ;;  %v1630_v36 = vsub.f32 %v1572_v47, %v1610_v44 }
 0x7dd   :  { %v1594_v50 = vpop.xlane.xlu0 %1593 }
 0x7de   :  { %v1622_v51 = vsub.f32 %v1614_v19, %v1618_v48  ;;  %v1609_v30 = vmul.f32 0.018518519, %v1594_v50  ;;  %v3376_v19 = vld [vmem:[%s3024_s26] ss:$0 sm:$0xff] }
 0x7df   :  { %v1598_v10 = vpop.xlane.xlu1 %1597 }
 0x7e0   :  { %v1626_v53 = vmax.f32 %v1622_v51, 0.0  ;;  %v1617_v46 = vmul.f32 %v1609_v30, %v1609_v30  ;;  %v1611_v49 = vmul.f32 0.018518519, %v1598_v10  ;;  %v1629_v35 = vsub.f32 %v3328_v56, %v1609_v30 }
 0x7e1   :  { %v1600_v52 = vpop.xlane.xlu0 %1599 }
 0x7e2   :  { %v1612_v2 = vmul.f32 0.018518519, %v1600_v52  ;;  %v1634_v60 = vadd.f32 1e-05, %v1626_v53  ;;  %v1619_v58 = vmul.f32 %v1611_v49, %v1611_v49  ;;  %v1631_v37 = vsub.f32 %v3331_v33, %v1611_v49  ;;  %v2073_v49 = vld [vmem:[%s2246_s10 + $0x8] sm:$0xff] }
 0x7e3   :  { %v1671_v14 = vpop.permute.xlu1 %1670 }
 0x7e4   :  { %v1620_v63 = vmul.f32 %v1612_v2, %v1612_v2  ;;  %2775 = vrsqrt.f32 %v1634_v60  ;;  %v1632_v16 = vsub.f32 %v1582_v32, %v1612_v2  ;;  %v1909_v60 = vld [vmem:[%s3367_s8 + $0x10] sm:$0xff] }
 0x7e5   :  { %v1608_v54 = vpop.xlane.xlu0 %1607 }
 0x7e6   :  { %v1616_v1 = vmul.f32 0.018518519, %v1608_v54  ;;  %v1908_v54 = vld [vmem:[%s3367_s8 + $0x8] sm:$0xff] }
 0x7e7   :  { %v1661_v21 = vpop.permute.xlu1 %1660 }
 0x7e8   :  { %v1624_v3 = vsub.f32 %v1616_v1, %v1620_v63  ;;  %v1910_v63 = vld [vmem:[%s3367_s8 + $0x18] sm:$0xff]  ;;  %v2655_v1 = vpop.f32.mrf.mxu0 }
 0x7e9   :  { %v1602_v9 = vpop.xlane.xlu0 %1601 }
 0x7ea   :  { %v1628_v5 = vmax.f32 %v1624_v3, 0.0  ;;  %v1613_v42 = vmul.f32 0.018518519, %v1602_v9  ;;  %v1771_v3 = vpop.f32.mrf.mxu0 }
 0x7ec   :  { %v1636_v7 = vadd.f32 1e-05, %v1628_v5  ;;  %v1621_v47 = vsub.f32 %v1613_v42, %v1617_v46  ;;  %v2658_v5 = vpop.f32.mrf.mxu0 }
 0x7ee   :  { %2777 = vrsqrt.f32 %v1636_v7  ;;  %v1625_v55 = vmax.f32 %v1621_v47, 0.0  ;;  %v1781_v7 = vpop.f32.mrf.mxu0  ;;  %v2075_v47 = vld [vmem:[%s2246_s10 + $0x18] sm:$0xff] }
 0x7f0   :  { %v1633_v31 = vadd.f32 1e-05, %v1625_v55  ;;  %v2677_v10 = vpop.f32.mrf.mxu0  ;;  %v2074_v55 = vld [vmem:[%s2246_s10 + $0x10] sm:$0xff] }
 0x7f1   :  { %v2776_v11 = vpop.eup %2775  ;;  %v1666_v43 = vpop.permute.xlu0 %1665 }
 0x7f2   :  { %v1642_v18 = vmul.f32 %v2776_v11, %v1630_v36  ;;  %2779 = vrsqrt.f32 %v1633_v31  ;;  %v1868_v11 = vpop.f32.mrf.mxu0  ;;  %v1874_v36 = vadd.f32 %v2677_v10, %v2655_v1 }
 0x7f3   :  { %v1869_v0 = vadd.f32 %v1868_v11, %v1771_v3 }
 0x7f4   :  { %v1674_v22 = vmul.f32 %v1661_v21, %v1642_v18  ;;  %vm1646_vm3 = vcmp.ge.f32.partialorder %v1642_v18, 0.0 }
 0x7f6   :  { %v1678_v28 = vsel %vm1646_vm3, %v1642_v18, %v1674_v22 }
 0x7f7   :  { %v1682_v29 = vmul.f32 %v3048_v8, %v1678_v28 }
 0x7fb   :  { %v2778_v20 = vpop.eup %2777 }
 0x7fc   :  { %v1644_v40 = vmul.f32 %v2778_v20, %v1632_v16 }
 0x7fe   :  { %vm1648_vm2 = vcmp.ge.f32.partialorder %v1644_v40, 0.0  ;;  %v1676_v23 = vmul.f32 %v1671_v14, %v1644_v40 }
 0x7ff   :  { %v2780_v59 = vpop.eup %2779 }
 0x800   :  { %v1680_v24 = vsel %vm1648_vm2, %v1644_v40, %v1676_v23  ;;  %v1641_v39 = vmul.f32 %v2780_v59, %v1629_v35 }
 0x801   :  { %v1684_v27 = vmul.f32 %v3048_v8, %v1680_v24  ;;  %v1687_v8 = vld [vmem:[%s3349_s4 + $0x10] sm:$0xff] }
 0x802   :  { %2678 = vmatprep.mubr.msk.f32.mxu0 %vm1153_vm9, %v1687_v8  ;;  %vm1645_vm12 = vcmp.ge.f32.partialorder %v1641_v39, 0.0 }
 0x803   :  { %1897 = vrot.lane.b32.xlu0 %v1684_v27, %s2795_s3  ;;  %2681 = vmatprep.subr.mxu1 %v1684_v27 }
 0x804   :  { %2682 = vmatpush3.msra.mxu1 %v1684_v27  ;;  %2679 = vmatmul.mubr.msk.f32.gmra.mxu0 %vm1153_vm9, %v1688_v13 }
 0x805   :  { %2719 = vmatprep.mubr.msk.f32.mxu0 %vm2808_vm6, %v2806_v12 }
 0x807   :  { %1893 = vrot.lane.b32.xlu0 %v1682_v29, %s2795_s3 }
 0x818   :  { %v1606_v57 = vpop.xlane.xlu1 %1605 }
 0x819   :  { %v1615_v61 = vmul.f32 0.018518519, %v1606_v57 }
 0x81b   :  { %v1623_v62 = vsub.f32 %v1615_v61, %v1619_v58  ;;  %v2072_v58 = vld [vmem:[%s2246_s10] sm:$0xff] }
 0x81c   :  { %v1656_v6 = vpop.permute.xlu1 %1655 }
 0x81d   :  { %v1627_v32 = vmax.f32 %v1623_v62, 0.0  ;;  %v1673_v44 = vmul.f32 %v1656_v6, %v1641_v39 }
 0x81f   :  { %v1635_v34 = vadd.f32 1e-05, %v1627_v32  ;;  %v1677_v56 = vsel %vm1645_vm12, %v1641_v39, %v1673_v44 }
 0x820   :  { %v1681_v33 = vmul.f32 %v3376_v19, %v1677_v56 }
 0x821   :  { %2781 = vrsqrt.f32 %v1635_v34 }
 0x82e   :  { %v2782_v38 = vpop.eup %2781 }
 0x82f   :  { %v1643_v41 = vmul.f32 %v2782_v38, %v1631_v37 }
 0x831   :  { %vm1647_vm4 = vcmp.ge.f32.partialorder %v1643_v41, 0.0  ;;  %v1675_v45 = vmul.f32 %v1666_v43, %v1643_v41 }
 0x833   :  { %v1679_v48 = vsel %vm1647_vm4, %v1643_v41, %v1675_v45 }
 0x834   :  { %v1683_v50 = vmul.f32 %v3376_v19, %v1679_v48 }
 0x836   :  { %1895 = vrot.lane.b32.xlu1 %v1683_v50, %s2795_s3  ;;  %2683 = vmatprep.subr.mxu1 %v1683_v50 }
 0x837   :  { %2684 = vmatpush3.msra.mxu1 %v1683_v50 }
 0x838   :  { %2685 = vmatprep.subr.mxu1 %v1682_v29 }
 0x839   :  { %2686 = vmatpush3.msra.mxu1 %v1682_v29 }
 0x83a   :  { %1891 = vrot.lane.b32.xlu1 %v1681_v33, %s2795_s3  ;;  %2687 = vmatprep.subr.mxu1 %v1681_v33 }
 0x83b   :  { %2688 = vmatpush3.msra.mxu1 %v1681_v33 }
 0x875   :  { %v1898_v51 = vpop.permute.xlu0 %1897 }
 0x876   :  { %2689 = vmatprep.subr.msk.mxu1 %vm2914_vm11, %v1898_v51 }
 0x877   :  { %2690 = vmatpush3.msk.msra.mxu1 %vm2914_vm11, %v1898_v51 }
 0x879   :  { %v1894_v53 = vpop.permute.xlu0 %1893 }
 0x8a8   :  { %v1896_v52 = vpop.permute.xlu1 %1895 }
 0x8a9   :  { %2691 = vmatprep.subr.msk.mxu1 %vm2914_vm11, %v1896_v52 }
 0x8aa   :  { %2692 = vmatpush3.msk.msra.mxu1 %vm2914_vm11, %v1896_v52 }
 0x8ab   :  { %2693 = vmatprep.subr.msk.mxu1 %vm2914_vm11, %v1894_v53 }
 0x8ac   :  { %2694 = vmatpush3.msk.msra.mxu1 %vm2914_vm11, %v1894_v53  ;;  %v1892_v2 = vpop.permute.xlu1 %1891 }
 0x8ad   :  { %2695 = vmatprep.subr.msk.mxu1 %vm2914_vm11, %v1892_v2 }
 0x8ae   :  { %2696 = vmatpush3.msk.msra.mxu1 %vm2914_vm11, %v1892_v2 }
 0x8af   :  { %2698 = vmatmul.mubr.msk.f32.vlgmr.msra.gmra.mxu1 %vm1153_vm9, %v1908_v54 }
 0x8b0   :  { %2700 = vmatprep.mubr.msk.f32.mxu1 %vm1153_vm9, %v1909_v60 }
 0x8b3   :  { %2701 = vmatmul.mubr.msk.f32.gmra.mxu1 %vm1153_vm9, %v1910_v63 }
 0x8c4   :  { %v2680_v14 = vpop.f32.mrf.mxu0 }
 0x8c5   :  { %v1884_v23 = vadd.f32 %v2680_v14, %v2658_v5 }
 0x8c6   :  { %v1878_v18 = vpop.f32.mrf.mxu0 }
 0x8c7   :  { %v1879_v24 = vadd.f32 %v1878_v18, %v1781_v7 }
 0x96f   :  { %v2699_v15 = vpop.f32.mrf.mxu1 }
 0x970   :  { %v1995_v16 = vadd.f32 %v2699_v15, %v1874_v36 }
 0x971   :  { %v1989_v20 = vpop.f32.mrf.mxu1 }
 0x972   :  { %v3404_v40 = vadd.f32 %v1989_v20, %v1869_v0  ;;  %v2009_v21 = vmul.f32 %v3376_v19, %v1995_v16 }
 0x973   :  { %v2702_v22 = vpop.f32.mrf.mxu1 }
 0x974   :  { %2018 = vadd.xlane.f32.xlu0 %v2009_v21  ;;  %v2013_v25 = vmul.f32 %v2009_v21, %v1995_v16  ;;  %v2005_v27 = vadd.f32 %v2702_v22, %v1884_v23  ;;  %v2008_v29 = vmul.f32 %v3376_v19, %v3404_v40 }
 0x975   :  { %v1999_v26 = vpop.f32.mrf.mxu1 }
 0x976   :  { %v3407_v28 = vadd.f32 %v1999_v26, %v1879_v24  ;;  %2026 = vadd.xlane.f32.xlu1 %v2013_v25  ;;  %v2011_v30 = vmul.f32 %v3376_v19, %v2005_v27  ;;  %v2012_v46 = vmul.f32 %v2008_v29, %v3404_v40 }
 0x978   :  { %2016 = vadd.xlane.f32.xlu0 %v2008_v29  ;;  %v2010_v9 = vmul.f32 %v3376_v19, %v3407_v28  ;;  %v2015_v42 = vmul.f32 %v2011_v30, %v2005_v27 }
 0x97a   :  { %2020 = vadd.xlane.f32.xlu1 %v2010_v9  ;;  %v2014_v57 = vmul.f32 %v2010_v9, %v3407_v28 }
 0x97c   :  { %2022 = vadd.xlane.f32.xlu0 %v2011_v30 }
 0x980   :  { %2030 = vadd.xlane.f32.xlu0 %v2015_v42 }
 0x984   :  { %2024 = vadd.xlane.f32.xlu0 %v2012_v46 }
 0x98b   :  { %2093 = vperm.xlu1 %2757, %v2075_v47  }
 0x98f   :  { %2083 = vperm.xlu1 %2757, %v2073_v49  }
 0x99a   :  { %2088 = vperm.xlu0 %2758, %v2074_v55  }
 0x9b3   :  { %2028 = vadd.xlane.f32.xlu1 %v2014_v57 }
 0x9c4   :  { %2078 = vperm.xlu1 %2757, %v2072_v58  }
 0x9fd   :  { %v2019_v61 = vpop.xlane.xlu0 %2018 }
 0x9fe   :  { %v2033_v31 = vmul.f32 0.018518519, %v2019_v61 }
 0x9ff   :  { %v2027_v62 = vpop.xlane.xlu1 %2026 }
 0xa00   :  { %v2041_v32 = vmul.f32 %v2033_v31, %v2033_v31  ;;  %v2037_v34 = vmul.f32 0.018518519, %v2027_v62  ;;  %v2053_v56 = vsub.f32 %v1995_v16, %v2033_v31  ;;  %v2128_v31 = vld [vmem:[%s2247_s15] sm:$0x3] }
 0xa01   :  { %v2017_v8 = vpop.xlane.xlu0 %2016 }
 0xa02   :  { %v2045_v13 = vsub.f32 %v2037_v34, %v2041_v32  ;;  %v2032_v10 = vmul.f32 0.018518519, %v2017_v8 }
 0xa03   :  { %v2021_v45 = vpop.xlane.xlu1 %2020 }
 0xa04   :  { %v2049_v35 = vmax.f32 %v2045_v13, 0.0  ;;  %v2040_v14 = vmul.f32 %v2032_v10, %v2032_v10  ;;  %v2034_v15 = vmul.f32 0.018518519, %v2021_v45  ;;  %v2052_v26 = vsub.f32 %v3404_v40, %v2032_v10  ;;  %v2794_v13 = vld [vmem:[%s2970_s18] ss:$0 sm:$0xff] }
 0xa05   :  { %v2023_v59 = vpop.xlane.xlu0 %2022 }
 0xa06   :  { %v2035_v37 = vmul.f32 0.018518519, %v2023_v59  ;;  %v2057_v6 = vadd.f32 1e-05, %v2049_v35  ;;  %v2042_v18 = vmul.f32 %v2034_v15, %v2034_v15 }
 0xa07   :  { %v2094_v50 = vpop.permute.xlu1 %2093 }
 0xa08   :  { %v2043_v17 = vmul.f32 %v2035_v37, %v2035_v37  ;;  %2783 = vrsqrt.f32 %v2057_v6  ;;  %v2055_v33 = vsub.f32 %v2005_v27, %v2035_v37  ;;  %v2054_v27 = vsub.f32 %v3407_v28, %v2034_v15 }
 0xa09   :  { %v2031_v38 = vpop.xlane.xlu0 %2030 }
 0xa0a   :  { %v2039_v39 = vmul.f32 0.018518519, %v2031_v38 }
 0xa0b   :  { %v2084_v2 = vpop.permute.xlu1 %2083 }
 0xa0c   :  { %v2047_v41 = vsub.f32 %v2039_v39, %v2043_v17 }
 0xa0d   :  { %v2025_v7 = vpop.xlane.xlu0 %2024 }
 0xa0e   :  { %v2051_v43 = vmax.f32 %v2047_v41, 0.0  ;;  %v2036_v11 = vmul.f32 0.018518519, %v2025_v7 }
 0xa10   :  { %v2059_v44 = vadd.f32 1e-05, %v2051_v43  ;;  %v2044_v36 = vsub.f32 %v2036_v11, %v2040_v14 }
 0xa12   :  { %2785 = vrsqrt.f32 %v2059_v44  ;;  %v2048_v0 = vmax.f32 %v2044_v36, 0.0 }
 0xa14   :  { %v2056_v21 = vadd.f32 1e-05, %v2048_v0 }
 0xa15   :  { %v2784_v48 = vpop.eup %2783  ;;  %v2089_v46 = vpop.permute.xlu0 %2088 }
 0xa16   :  { %v2065_v51 = vmul.f32 %v2784_v48, %v2053_v56  ;;  %2787 = vrsqrt.f32 %v2056_v21 }
 0xa18   :  { %v2097_v54 = vmul.f32 %v2084_v2, %v2065_v51  ;;  %vm2069_vm13 = vcmp.ge.f32.partialorder %v2065_v51, 0.0 }
 0xa1a   :  { %v2101_v3 = vsel %vm2069_vm13, %v2065_v51, %v2097_v54 }
 0xa1b   :  { %v2105_v5 = vmul.f32 %v3376_v19, %v2101_v3 }
 0xa1f   :  { %v2786_v52 = vpop.eup %2785 }
 0xa20   :  { %v2067_v53 = vmul.f32 %v2786_v52, %v2055_v33 }
 0xa22   :  { %vm2071_vm6 = vcmp.ge.f32.partialorder %v2067_v53, 0.0  ;;  %v2099_v60 = vmul.f32 %v2094_v50, %v2067_v53 }
 0xa23   :  { %v2788_v25 = vpop.eup %2787 }
 0xa24   :  { %v2103_v63 = vsel %vm2071_vm6, %v2067_v53, %v2099_v60  ;;  %v2064_v30 = vmul.f32 %v2788_v25, %v2052_v26 }
 0xa25   :  { %v2107_v1 = vmul.f32 %v3376_v19, %v2103_v63 }
 0xa26   :  { %vm2068_vm0 = vcmp.ge.f32.partialorder %v2064_v30, 0.0 }
 0xa27   :  { %2704 = vmatpush3.msra.mxu0 %v2107_v1  ;;  %2118 = vrot.lane.b32.xlu0 %v2107_v1, %s2795_s3 }
 0xa28   :  { %2705 = vmatprep.subr.mxu0 %v2806_v12 }
 0xa2b   :  { %2114 = vrot.lane.b32.xlu0 %v2105_v5, %s2795_s3 }
 0xa3c   :  { %v2029_v16 = vpop.xlane.xlu1 %2028 }
 0xa3d   :  { %v2038_v20 = vmul.f32 0.018518519, %v2029_v16 }
 0xa3f   :  { %v2046_v22 = vsub.f32 %v2038_v20, %v2042_v18 }
 0xa40   :  { %v2079_v9 = vpop.permute.xlu1 %2078 }
 0xa41   :  { %v2050_v23 = vmax.f32 %v2046_v22, 0.0  ;;  %v2096_v47 = vmul.f32 %v2079_v9, %v2064_v30 }
 0xa43   :  { %v2058_v24 = vadd.f32 1e-05, %v2050_v23  ;;  %v2100_v58 = vsel %vm2068_vm0, %v2064_v30, %v2096_v47 }
 0xa44   :  { %v2104_v40 = vmul.f32 %v3376_v19, %v2100_v58 }
 0xa45   :  { %2789 = vrsqrt.f32 %v2058_v24 }
 0xa52   :  { %v2790_v29 = vpop.eup %2789 }
 0xa53   :  { %v2066_v42 = vmul.f32 %v2790_v29, %v2054_v27 }
 0xa55   :  { %vm2070_vm14 = vcmp.ge.f32.partialorder %v2066_v42, 0.0  ;;  %v2098_v49 = vmul.f32 %v2089_v46, %v2066_v42 }
 0xa57   :  { %v2102_v55 = vsel %vm2070_vm14, %v2066_v42, %v2098_v49 }
 0xa58   :  { %v2106_v57 = vmul.f32 %v3376_v19, %v2102_v55 }
 0xa5a   :  { %2116 = vrot.lane.b32.xlu1 %v2106_v57, %s2795_s3  ;;  %2706 = vmatpush3.msra.mxu0 %v2106_v57 }
 0xa5b   :  { %2707 = vmatprep.subr.mxu0 %v2806_v12 }
 0xa5c   :  { %2708 = vmatpush3.msra.mxu0 %v2105_v5 }
 0xa5d   :  { %2709 = vmatprep.subr.mxu0 %v2806_v12 }
 0xa5e   :  { %2112 = vrot.lane.b32.xlu1 %v2104_v40, %s2795_s3  ;;  %2710 = vmatpush3.msra.mxu0 %v2104_v40  ;;  %s2829_s3 = smov 31  }
 0xa5f   :  { %2711 = vmatprep.subr.mxu0 %v2806_v12  ;;  %s2248_s19 = sld [smem:[%s3453_s0 + %s2829_s3]]  }
 0xa99   :  { %v2119_v28 = vpop.permute.xlu0 %2118 }
 0xa9a   :  { %2712 = vmatpush3.msk.msra.mxu0 %vm2914_vm11, %v2119_v28 }
 0xa9b   :  { %2713 = vmatprep.subr.mxu0 %v2806_v12 }
 0xa9d   :  { %v2115_v61 = vpop.permute.xlu0 %2114 }
 0xacc   :  { %v2117_v19 = vpop.permute.xlu1 %2116 }
 0xacd   :  { %2714 = vmatpush3.msk.msra.mxu0 %vm2914_vm11, %v2117_v19 }
 0xace   :  { %2715 = vmatprep.subr.mxu0 %v2806_v12 }
 0xacf   :  { %2716 = vmatpush3.msk.msra.mxu0 %vm2914_vm11, %v2115_v61 }
 0xad0   :  { %v2113_v62 = vpop.permute.xlu1 %2112  ;;  %2717 = vmatprep.subr.mxu0 %v2806_v12 }
 0xad1   :  { %2718 = vmatpush3.msk.msra.mxu0 %vm2914_vm11, %v2113_v62 }
 0xad2   :  { %2720 = vmatmul.mubr.msk.f32.vlgmr.msra.gmra.mxu0 %vm1153_vm9, %v2128_v31 }
 0xb92   :  { %v2198_v32 = vpop.f32.mrf.mxu0 }
 0xb93   :  { %v2202_v34 = vmax.f32 %v2198_v32, 1e-08 }
 0xb94   :  { %v2721_v8 = vpop.f32.mrf.mxu0 }
 0xb95   :  { %v2204_v59 = vmul.f32 %v2794_v13, %v2202_v34  ;;  %2791 = vlog2.f32 %v2202_v34 }
 0xb97   :  { %v2206_v35 = vrot.slane %v2204_v59, 1 }
 0xb99   :  { %v2208_v37 = vadd.f32 %v2206_v35, %v2198_v32 }
 0xb9b   :  { %2209 = vst [vmem:[%s2248_s19] sm:$0x1] %v2208_v37 }
 0xba2   :  { %v2792_v12 = vpop.eup %2791 }
 0xba3   :  { %v2211_v38 = vmul.f32 0.6931472, %v2792_v12 }
 0xba5   :  { %v2212_v4 = vsub.f32 0.0, %v2211_v38 }
 0xba7   :  { %2213 = vst [vmem:[%s2248_s19] sm:$0x2] %v2212_v4 }

</bundles_post_ra>
